<compile_context>
chip_gen: v7x
topology: tpu7x:2x2x1
jax: 0.10.0
libtpu: 0.0.40
codegen_flags: <defaults>
</compile_context>

<pallas_src>
import math

import jax
import jax.numpy as jnp
from jax.experimental import pallas as pl
from jax.experimental.pallas import tpu as pltpu

_LANE = 128
# Sized for v7x's 64 MiB physical VMEM; default bf16 tiles use ~10 MiB.
_VMEM_LIMIT_BYTES = 32 * 1024 * 1024


def _round_up(x, m):
    return (x + m - 1) // m * m


def _pad2(a, rows, cols):
    return jnp.pad(a, ((0, rows - a.shape[0]), (0, cols - a.shape[1])))


# --------------------------------------------------------------------------
# Kernel 1: row-tiled feature transform   o = d * (x @ w)
# --------------------------------------------------------------------------
def _xw_kernel(x_ref, d_ref, w_ref, o_ref):
    xw = jnp.dot(x_ref[...], w_ref[...], preferred_element_type=jnp.float32)
    o_ref[...] = (d_ref[...] * xw).astype(o_ref.dtype)


def feature_transform(x, d_col, w, *, tm, out_dtype):
    n_pad, f_in = x.shape
    f_out = w.shape[1]
    return pl.pallas_call(
        _xw_kernel,
        out_shape=jax.ShapeDtypeStruct((n_pad, f_out), out_dtype),
        grid_spec=pltpu.PrefetchScalarGridSpec(
            num_scalar_prefetch=0,
            grid=(n_pad // tm,),
            in_specs=[
                pl.BlockSpec((tm, f_in), lambda i: (i, 0)),
                pl.BlockSpec((tm, 1), lambda i: (i, 0)),
                pl.BlockSpec((f_in, f_out), lambda i: (0, 0)),
            ],
            out_specs=pl.BlockSpec((tm, f_out), lambda i: (i, 0)),
        ),
        compiler_params=pltpu.CompilerParams(
            dimension_semantics=("parallel",),
            vmem_limit_bytes=_VMEM_LIMIT_BYTES,
        ),
    )(x, d_col, w)


# --------------------------------------------------------------------------
# Kernels 2/3: tiled aggregation  acc = sum_k A[i,k] @ XW[k]  with fused
# normalization / bias finalize.  Fused variant also applies ReLU and the
# next layer's feature transform so h1 never round-trips HBM.
# --------------------------------------------------------------------------
def _aggregate_kernel(nnz_ref, _remap_ref, a_ref, xw_ref, d_ref, b_ref, o_ref):
    """Non-fused: accumulate directly into the resident f32 output block."""
    i = pl.program_id(0)
    k = pl.program_id(1)
    nk = pl.num_programs(1)

    @pl.when(k == 0)
    def _():
        o_ref[...] = jnp.zeros_like(o_ref)

    # Skip MXU work for all-zero adjacency blocks (the index_map also re-uses
    # the previous nonzero block index so the DMA is skipped too).
    @pl.when(nnz_ref[i * nk + k] > 0)
    def _():
        o_ref[...] += jnp.dot(
            a_ref[...], xw_ref[...], preferred_element_type=jnp.float32
        )

    @pl.when(k == nk - 1)
    def _():
        o_ref[...] = d_ref[...] * o_ref[...] + b_ref[...]


def _aggregate_fused_kernel(nnz_ref, _remap_ref, a_ref, xw_ref, d_ref, b_ref,
                            w2_ref, o_ref, acc_ref):
    """Fused: bias + ReLU + next layer's (D^-1/2 h1) @ W2 in the finalize."""
    i = pl.program_id(0)
    k = pl.program_id(1)
    nk = pl.num_programs(1)

    @pl.when(k == 0)
    def _():
        acc_ref[...] = jnp.zeros_like(acc_ref)

    @pl.when(nnz_ref[i * nk + k] > 0)
    def _():
        acc_ref[...] += jnp.dot(
            a_ref[...], xw_ref[...], preferred_element_type=jnp.float32
        )

    @pl.when(k == nk - 1)
    def _():
        h = jnp.maximum(d_ref[...] * acc_ref[...] + b_ref[...], 0.0)
        # Keep h in VMEM so the epilogue matmul streams from memory instead of
        # holding a (tm, f_mid) live value across VPU + MXU (vreg pressure).
        acc_ref[...] = h
        xw2 = jnp.dot(
            acc_ref[...].astype(w2_ref.dtype), w2_ref[...],
            preferred_element_type=jnp.float32,
        )
        o_ref[...] = (d_ref[...] * xw2).astype(o_ref.dtype)


def aggregate(adj, xw, d_col, b_row, nnz, remap, *, tm, tk, w2=None,
              out_dtype=jnp.float32):
    n_pad = adj.shape[0]
    f_mid = xw.shape[1]
    ni, nk = n_pad // tm, n_pad // tk

    def a_map(i, k, nnz_ref, remap_ref):
        return (i, remap_ref[i * nk + k])

    def xw_map(i, k, nnz_ref, remap_ref):
        return (remap_ref[i * nk + k], 0)

    def row_map(i, k, nnz_ref, remap_ref):
        return (i, 0)

    def const_map(i, k, nnz_ref, remap_ref):
        return (0, 0)

    in_specs = [
        pl.BlockSpec((tm, tk), a_map),           # A tile, streamed over k
        pl.BlockSpec((tk, f_mid), xw_map),       # matching XW tile
        pl.BlockSpec((tm, 1), row_map),          # D^-1/2 for this row tile
        pl.BlockSpec((1, b_row.shape[1]), const_map),
    ]
    operands = [adj, xw, d_col, b_row]

    if w2 is not None:
        f_out = w2.shape[1]
        in_specs.append(pl.BlockSpec((f_mid, f_out), const_map))
        operands.append(w2)
        kernel = _aggregate_fused_kernel
        scratch = [pltpu.VMEM((tm, f_mid), jnp.float32)]
    else:
        f_out = f_mid
        kernel = _aggregate_kernel
        scratch = []

    return pl.pallas_call(
        kernel,
        out_shape=jax.ShapeDtypeStruct((n_pad, f_out), out_dtype),
        grid_spec=pltpu.PrefetchScalarGridSpec(
            num_scalar_prefetch=2,
            grid=(ni, nk),
            in_specs=in_specs,
            out_specs=pl.BlockSpec((tm, f_out), row_map),
            scratch_shapes=scratch,
        ),
        compiler_params=pltpu.CompilerParams(
            dimension_semantics=("parallel", "arbitrary"),
            vmem_limit_bytes=_VMEM_LIMIT_BYTES,
        ),
    )(nnz, remap, *operands)


# --------------------------------------------------------------------------
# Plain-JAX glue: adjacency (built once, padded, in the compute dtype),
# O(E) degree and block-sparsity metadata.
# --------------------------------------------------------------------------
def build_adjacency_padded(edge_index, num_nodes, n_pad, dtype):
    """Dense (A + I), duplicate edges summed, built directly at (n_pad, n_pad).

    bf16 is exact for edge multiplicities <= 256 (fine for normal edge lists).
    """
    src, dst = edge_index[0], edge_index[1]
    adj = jnp.zeros((n_pad, n_pad), dtype=dtype)
    # PyG message passing scatter-adds per-edge contributions into targets.
    adj = adj.at[dst, src].add(jnp.ones(src.shape, dtype=dtype))
    # add_remaining_self_loops: weight-1 self loop only where none exists.
    node = jnp.arange(num_nodes, dtype=src.dtype)
    diag = adj[node, node]
    adj = adj.at[node, node].add((diag == 0).astype(dtype))
    return adj


def degree_inv_sqrt(edge_index, num_nodes, n_pad):
    """D^-1/2 of (A+I) computed O(E) from edge_index (row-sum semantics)."""
    src, dst = edge_index[0], edge_index[1]
    deg = jnp.zeros((num_nodes,), jnp.float32).at[dst].add(1.0)
    has_self = (
        jnp.zeros((num_nodes,), jnp.int32)
        .at[dst].add((src == dst).astype(jnp.int32))
    ) > 0
    deg = deg + jnp.where(has_self, 0.0, 1.0)
    dinv = jnp.where(deg > 0, jax.lax.rsqrt(deg), 0.0)
    return jnp.pad(dinv, (0, n_pad - num_nodes)).reshape(n_pad, 1)


def _block_metadata_from_edges(edge_index, num_nodes, n_pad, tm, tk):
    """Per-(row-block, k-block) nonzero counts + 'reuse previous nonzero' remap,
    computed O(E) from the edge list (no N^2 pass)."""
    ni, nk = n_pad // tm, n_pad // tk
    src, dst = edge_index[0], edge_index[1]
    edge_blk = (dst // tm) * nk + (src // tk)
    nnz = jnp.zeros((ni * nk,), jnp.int32).at[edge_blk].add(1)
    # every real node has a nonzero diagonal entry (self loop), count it too
    node = jnp.arange(num_nodes, dtype=src.dtype)
    diag_blk = (node // tm) * nk + (node // tk)
    nnz = nnz.at[diag_blk].add(1)

    nnz2 = nnz.reshape(ni, nk)
    cand = jnp.where(nnz2 > 0, jnp.arange(nk, dtype=jnp.int32)[None, :], -1)
    remap = jnp.maximum(jax.lax.cummax(cand, axis=1), 0).astype(jnp.int32)
    return nnz, remap.reshape(-1)


def _choose_tiles(n, tm, tk):
    """Clamp tiles to the graph, pad node count so both tiles divide it, and
    keep >= 2 row blocks when possible (v7x has 2 TensorCores)."""
    n_p0 = _round_up(n, _LANE)
    tm = max(8, min(tm, n_p0))
    tk = max(_LANE, min(tk, n_p0))
    n_p = _round_up(n_p0, math.lcm(tm, tk))
    while n_p // tm < 2 and tm >= 256:
        tm //= 2
    return n_p, tm, tk


def gcn_forward(x, edge_index, params, *, tm=512, tk=2048,
                compute_dtype=jnp.bfloat16):
    """2-layer GCN forward. tm/tk: adjacency tile (rows, k).  Keep tk <= 2048
    f32-equivalent on v7x; for sparse graphs sweep tk DOWN so block skipping
    fires."""
    n, f_in = x.shape
    hid = params["w1"].shape[1]
    out_dim = params["w2"].shape[1]

    # Lane-dense feature padding; hidden padded to 256 only when it exceeds one
    # MXU half-width (extra zero columns cost HBM bytes while memory-bound).
    f_in_p = _round_up(f_in, _LANE)
    hid_p = _round_up(hid, 256) if hid > _LANE else _round_up(hid, _LANE)
    out_p = _round_up(out_dim, _LANE)

    n_p, tm, tk = _choose_tiles(n, tm, tk)

    # Adjacency built once, at padded size, in the compute dtype (no extra
    # N^2 diag/pad/astype passes).  D^-1/2 and block metadata are O(E).
    adj_p = build_adjacency_padded(edge_index, n, n_p, compute_dtype)
    d_col = degree_inv_sqrt(edge_index, n, n_p)
    nnz, remap = _block_metadata_from_edges(edge_index, n, n_p, tm, tk)

    x_p = _pad2(x, n_p, f_in_p).astype(compute_dtype)
    w1_p = _pad2(params["w1"], f_in_p, hid_p).astype(compute_dtype)
    b1_p = jnp.pad(params["b1"], (0, hid_p - hid)).reshape(1, hid_p).astype(jnp.float32)
    w2_p = _pad2(params["w2"], hid_p, out_p).astype(compute_dtype)
    b2_p = jnp.pad(params["b2"], (0, out_p - out_dim)).reshape(1, out_p).astype(jnp.float32)

    # layer-1 feature transform: xw1 = D^-1/2 X W1
    xw1 = feature_transform(x_p, d_col, w1_p, tm=tm, out_dtype=compute_dtype)

    # layer-1 aggregation fused with layer-2 transform:
    #   xw2 = D^-1/2 relu(A_hat X W1 + b1) W2     (h1 stays in VMEM)
    # dropout: identity (eval mode)
    xw2 = aggregate(adj_p, xw1, d_col, b1_p, nnz, remap, tm=tm, tk=tk,
                    w2=w2_p, out_dtype=compute_dtype)

    # layer-2 aggregation: out = A_hat h1 W2 + b2   (f32 output, in-place acc)
    out_full = aggregate(adj_p, xw2, d_col, b2_p, nnz, remap, tm=tm, tk=tk,
                         w2=None, out_dtype=jnp.float32)
    return out_full[:n, :out_dim]


def init_params(key, input_dim, hidden_dim, output_dim, dtype=jnp.float32):
    k1, k2 = jax.random.split(key)

    def glorot(k, fan_in, fan_out):
        limit = jnp.sqrt(6.0 / (fan_in + fan_out))
        return jax.random.uniform(
            k, (fan_in, fan_out), dtype=dtype, minval=-limit, maxval=limit
        )

    return {
        "w1": glorot(k1, input_dim, hidden_dim),
        "b1": jnp.zeros((hidden_dim,), dtype=dtype),
        "w2": glorot(k2, hidden_dim, output_dim),
        "b2": jnp.zeros((output_dim,), dtype=dtype),
    }


if __name__ == "__main__":
    key = jax.random.PRNGKey(0)
    k_x, k_e, k_p = jax.random.split(key, 3)

    num_nodes = 16
    input_dim, hidden_dim, output_dim = 8, 32, 4
    num_edges = 32

    x = jax.random.normal(k_x, (num_nodes, input_dim), dtype=jnp.float32)
    edge_index = jax.random.randint(
        k_e, (2, num_edges), minval=0, maxval=num_nodes, dtype=jnp.int32
    )
    params = init_params(k_p, input_dim, hidden_dim, output_dim)

    out = jax.jit(gcn_forward)(x, edge_index, params)
    jax.block_until_ready(out)
    assert out.shape == (num_nodes, output_dim)

    # plain-JAX f32 reference (same adjacency semantics) for a sanity check
    src, dst = edge_index[0], edge_index[1]
    adj = jnp.zeros((num_nodes, num_nodes), jnp.float32).at[dst, src].add(1.0)
    diag = jnp.diagonal(adj)
    adj = adj + jnp.diag(jnp.where(diag == 0, 1.0, 0.0))
    deg = adj.sum(axis=1)
    dinv = jnp.where(deg > 0, jax.lax.rsqrt(deg), 0.0)
    a_hat = dinv[:, None] * adj * dinv[None, :]
    h1 = jax.nn.relu(a_hat @ (x @ params["w1"]) + params["b1"])
    ref = a_hat @ (h1 @ params["w2"]) + params["b2"]
    assert jnp.allclose(out, ref, rtol=3e-2, atol=3e-2), "mismatch vs reference"

    print("KERNEL_OK")
</pallas_src>

<mosaic_0001>
module attributes {stable_mosaic.version = 11 : i64} {
  func.func private @main(%arg0: i32) attributes {dimension_semantics = [#tpu.dimension_semantics<core_parallel>], iteration_bounds = array<i64: 2>, tpu.core_type = #tpu.core_type<sc_scalar_subcore>, window_params = []} {
    return
  }
}

module attributes {stable_mosaic.version = 11 : i64} {
  func.func private @main(%arg0: i32) attributes {dimension_semantics = [#tpu.dimension_semantics<core_parallel>], iteration_bounds = array<i64: 2>, tpu.core_type = #tpu.core_type<sc_scalar_subcore>, window_params = []} {
    return
  }
}

module attributes {stable_mosaic.version = 11 : i64} {
  func.func @_aggregate_fused_kernel(%arg0: i32, %arg1: i32, %arg2: memref<1xi32, #tpu.memory_space<smem>>, %arg3: memref<1xi32, #tpu.memory_space<smem>>, %arg4: memref<128x128xbf16, #tpu.memory_space<vmem>>, %arg5: memref<128x128xbf16, #tpu.memory_space<vmem>>, %arg6: memref<128x1xf32, #tpu.memory_space<vmem>>, %arg7: memref<1x128xf32, #tpu.memory_space<vmem>>, %arg8: memref<128x128xbf16, #tpu.memory_space<vmem>>, %arg9: memref<128x128xbf16, #tpu.memory_space<vmem>>, %arg10: memref<128x128xf32, #tpu.memory_space<vmem>>) attributes {dimension_semantics = [#tpu.dimension_semantics<parallel>, #tpu.dimension_semantics<arbitrary>], iteration_bounds = array<i64: 1, 1>, scalar_prefetch = 2 : i64, scratch_operands = 1 : i64, tpu.core_type = #tpu.core_type<tc>, window_params = [{transform_indices = @transform_0, window_bounds = array<i64: 128, 128>}, {transform_indices = @transform_1, window_bounds = array<i64: 128, 128>}, {transform_indices = @transform_2, window_bounds = array<i64: 128, 1>}, {pipeline_mode = #tpu.pipeline_mode<synchronous>, transform_indices = @transform_3, window_bounds = array<i64: 1, 128>}, {pipeline_mode = #tpu.pipeline_mode<synchronous>, transform_indices = @transform_4, window_bounds = array<i64: 128, 128>}, {transform_indices = @transform_5, window_bounds = array<i64: 128, 128>}]} {
    %c0_i32 = arith.constant 0 : i32
    %0 = arith.cmpi eq, %arg1, %c0_i32 : i32
    %1 = arith.extui %0 : i1 to i32
    %c0_i32_0 = arith.constant 0 : i32
    %2 = arith.cmpi ne, %1, %c0_i32_0 : i32
    scf.if %2 {
      %cst = arith.constant 0.000000e+00 : f32
      %13 = vector.broadcast %cst : f32 to vector<128x128xf32>
      %c0 = arith.constant 0 : index
      %c0_5 = arith.constant 0 : index
      %14 = vector.load %arg10[%c0, %c0_5] : memref<128x128xf32, #tpu.memory_space<vmem>>, vector<128x128xf32>
      tpu.vector_store %arg10[%c0, %c0_5], %13 {strides = array<i32>} : memref<128x128xf32, #tpu.memory_space<vmem>>, vector<128x128xf32>,
    } else {
    }
    %c1_i32 = arith.constant 1 : i32
    %3 = arith.muli %arg0, %c1_i32 : i32
    %4 = arith.addi %3, %arg1 : i32
    %5 = arith.index_cast %4 : i32 to index
    %6 = memref.load %arg2[%5] : memref<1xi32, #tpu.memory_space<smem>>
    %c0_i32_1 = arith.constant 0 : i32
    %7 = arith.cmpi sgt, %6, %c0_i32_1 : i32
    %8 = arith.extui %7 : i1 to i32
    %c0_i32_2 = arith.constant 0 : i32
    %9 = arith.cmpi ne, %8, %c0_i32_2 : i32
    scf.if %9 {
      %c0 = arith.constant 0 : index
      %c0_5 = arith.constant 0 : index
      %13 = vector.load %arg10[%c0, %c0_5] : memref<128x128xf32, #tpu.memory_space<vmem>>, vector<128x128xf32>
      %c0_6 = arith.constant 0 : index
      %c0_7 = arith.constant 0 : index
      %14 = vector.load %arg4[%c0_6, %c0_7] : memref<128x128xbf16, #tpu.memory_space<vmem>>, vector<128x128xbf16>
      %c0_8 = arith.constant 0 : index
      %c0_9 = arith.constant 0 : index
      %15 = vector.load %arg5[%c0_8, %c0_9] : memref<128x128xbf16, #tpu.memory_space<vmem>>, vector<128x128xbf16>
      %cst = arith.constant dense<0.000000e+00> : vector<128x128xf32>
      %16 = tpu.matmul %14, %15, %cst {dimension_numbers = #tpu.dot_dimension_numbers<[1], [0], [0], [1], [0, 0, 1, 1], [], []>} : vector<128x128xbf16>, vector<128x128xbf16>, vector<128x128xf32> -> vector<128x128xf32>
      %17 = arith.addf %13, %16 : vector<128x128xf32>
      %c0_10 = arith.constant 0 : index
      %c0_11 = arith.constant 0 : index
      %18 = vector.load %arg10[%c0_10, %c0_11] : memref<128x128xf32, #tpu.memory_space<vmem>>, vector<128x128xf32>
      tpu.vector_store %arg10[%c0_10, %c0_11], %17 {strides = array<i32>} : memref<128x128xf32, #tpu.memory_space<vmem>>, vector<128x128xf32>,
    } else {
    }
    %c0_i32_3 = arith.constant 0 : i32
    %10 = arith.cmpi eq, %arg1, %c0_i32_3 : i32
    %11 = arith.extui %10 : i1 to i32
    %c0_i32_4 = arith.constant 0 : i32
    %12 = arith.cmpi ne, %11, %c0_i32_4 : i32
    scf.if %12 {
      %c0 = arith.constant 0 : index
      %c0_5 = arith.constant 0 : index
      %13 = vector.load %arg6[%c0, %c0_5] : memref<128x1xf32, #tpu.memory_space<vmem>>, vector<128x1xf32>
      %c0_6 = arith.constant 0 : index
      %c0_7 = arith.constant 0 : index
      %14 = vector.load %arg10[%c0_6, %c0_7] : memref<128x128xf32, #tpu.memory_space<vmem>>, vector<128x128xf32>
      %15 = vector.broadcast %13 : vector<128x1xf32> to vector<128x128xf32>
      %16 = arith.mulf %15, %14 : vector<128x128xf32>
      %c0_8 = arith.constant 0 : index
      %c0_9 = arith.constant 0 : index
      %17 = vector.load %arg7[%c0_8, %c0_9] : memref<1x128xf32, #tpu.memory_space<vmem>>, vector<1x128xf32>
      %18 = vector.broadcast %17 : vector<1x128xf32> to vector<128x128xf32>
      %19 = arith.addf %16, %18 : vector<128x128xf32>
      %cst = arith.constant 0.000000e+00 : f32
      %20 = vector.broadcast %cst : f32 to vector<128x128xf32>
      %21 = arith.maximumf %19, %20 : vector<128x128xf32>
      %c0_10 = arith.constant 0 : index
      %c0_11 = arith.constant 0 : index
      %22 = vector.load %arg10[%c0_10, %c0_11] : memref<128x128xf32, #tpu.memory_space<vmem>>, vector<128x128xf32>
      tpu.vector_store %arg10[%c0_10, %c0_11], %21 {strides = array<i32>} : memref<128x128xf32, #tpu.memory_space<vmem>>, vector<128x128xf32>,
      %c0_12 = arith.constant 0 : index
      %c0_13 = arith.constant 0 : index
      %23 = vector.load %arg10[%c0_12, %c0_13] : memref<128x128xf32, #tpu.memory_space<vmem>>, vector<128x128xf32>
      %24 = arith.truncf %23 : vector<128x128xf32> to vector<128x128xbf16>
      %c0_14 = arith.constant 0 : index
      %c0_15 = arith.constant 0 : index
      %25 = vector.load %arg8[%c0_14, %c0_15] : memref<128x128xbf16, #tpu.memory_space<vmem>>, vector<128x128xbf16>
      %cst_16 = arith.constant dense<0.000000e+00> : vector<128x128xf32>
      %26 = tpu.matmul %24, %25, %cst_16 {dimension_numbers = #tpu.dot_dimension_numbers<[1], [0], [0], [1], [0, 0, 1, 1], [], []>} : vector<128x128xbf16>, vector<128x128xbf16>, vector<128x128xf32> -> vector<128x128xf32>
      %c0_17 = arith.constant 0 : index
      %c0_18 = arith.constant 0 : index
      %27 = vector.load %arg6[%c0_17, %c0_18] : memref<128x1xf32, #tpu.memory_space<vmem>>, vector<128x1xf32>
      %28 = vector.broadcast %27 : vector<128x1xf32> to vector<128x128xf32>
      %29 = arith.mulf %28, %26 : vector<128x128xf32>
      %30 = arith.truncf %29 : vector<128x128xf32> to vector<128x128xbf16>
      %c0_19 = arith.constant 0 : index
      %c0_20 = arith.constant 0 : index
      %31 = vector.load %arg9[%c0_19, %c0_20] : memref<128x128xbf16, #tpu.memory_space<vmem>>, vector<128x128xbf16>
      tpu.vector_store %arg9[%c0_19, %c0_20], %30 {strides = array<i32>} : memref<128x128xbf16, #tpu.memory_space<vmem>>, vector<128x128xbf16>,
    } else {
    }
    return
  }
  func.func @transform_0(%arg0: i32, %arg1: i32, %arg2: memref<1xi32, #tpu.memory_space<smem>>, %arg3: memref<1xi32, #tpu.memory_space<smem>>) -> (i32, i32) {
    %c1_i32 = arith.constant 1 : i32
    %0 = arith.muli %arg0, %c1_i32 : i32
    %1 = arith.addi %0, %arg1 : i32
    %2 = arith.index_cast %1 : i32 to index
    %3 = memref.load %arg3[%2] : memref<1xi32, #tpu.memory_space<smem>>
    %c0_i32 = arith.constant 0 : i32
    return %arg0, %3 : i32, i32
  }
  func.func @transform_1(%arg0: i32, %arg1: i32, %arg2: memref<1xi32, #tpu.memory_space<smem>>, %arg3: memref<1xi32, #tpu.memory_space<smem>>) -> (i32, i32) {
    %c1_i32 = arith.constant 1 : i32
    %0 = arith.muli %arg0, %c1_i32 : i32
    %1 = arith.addi %0, %arg1 : i32
    %2 = arith.index_cast %1 : i32 to index
    %3 = memref.load %arg3[%2] : memref<1xi32, #tpu.memory_space<smem>>
    %c0_i32 = arith.constant 0 : i32
    %c0_i32_0 = arith.constant 0 : i32
    return %3, %c0_i32 : i32, i32
  }
  func.func @transform_2(%arg0: i32, %arg1: i32, %arg2: memref<1xi32, #tpu.memory_space<smem>>, %arg3: memref<1xi32, #tpu.memory_space<smem>>) -> (i32, i32) {
    %c0_i32 = arith.constant 0 : i32
    %c0_i32_0 = arith.constant 0 : i32
    return %arg0, %c0_i32 : i32, i32
  }
  func.func @transform_3(%arg0: i32, %arg1: i32, %arg2: memref<1xi32, #tpu.memory_space<smem>>, %arg3: memref<1xi32, #tpu.memory_space<smem>>) -> (i32, i32) {
    %c0_i32 = arith.constant 0 : i32
    %c0_i32_0 = arith.constant 0 : i32
    %c0_i32_1 = arith.constant 0 : i32
    return %c0_i32, %c0_i32_0 : i32, i32
  }
  func.func @transform_4(%arg0: i32, %arg1: i32, %arg2: memref<1xi32, #tpu.memory_space<smem>>, %arg3: memref<1xi32, #tpu.memory_space<smem>>) -> (i32, i32) {
    %c0_i32 = arith.constant 0 : i32
    %c0_i32_0 = arith.constant 0 : i32
    %c0_i32_1 = arith.constant 0 : i32
    return %c0_i32, %c0_i32_0 : i32, i32
  }
  func.func @transform_5(%arg0: i32, %arg1: i32, %arg2: memref<1xi32, #tpu.memory_space<smem>>, %arg3: memref<1xi32, #tpu.memory_space<smem>>) -> (i32, i32) {
    %c0_i32 = arith.constant 0 : i32
    %c0_i32_0 = arith.constant 0 : i32
    return %arg0, %c0_i32 : i32, i32
  }
}

module attributes {stable_mosaic.version = 11 : i64} {
  func.func @_xw_kernel(%arg0: i32, %arg1: memref<128x128xbf16, #tpu.memory_space<vmem>>, %arg2: memref<128x1xf32, #tpu.memory_space<vmem>>, %arg3: memref<128x128xbf16, #tpu.memory_space<vmem>>, %arg4: memref<128x128xbf16, #tpu.memory_space<vmem>>) attributes {dimension_semantics = [#tpu.dimension_semantics<parallel>], iteration_bounds = array<i64: 1>, scalar_prefetch = 0 : i64, scratch_operands = 0 : i64, tpu.core_type = #tpu.core_type<tc>, window_params = [{transform_indices = @transform_0, window_bounds = array<i64: 128, 128>}, {transform_indices = @transform_1, window_bounds = array<i64: 128, 1>}, {pipeline_mode = #tpu.pipeline_mode<synchronous>, transform_indices = @transform_2, window_bounds = array<i64: 128, 128>}, {transform_indices = @transform_3, window_bounds = array<i64: 128, 128>}]} {
    %c0 = arith.constant 0 : index
    %c0_0 = arith.constant 0 : index
    %0 = vector.load %arg1[%c0, %c0_0] : memref<128x128xbf16, #tpu.memory_space<vmem>>, vector<128x128xbf16>
    %c0_1 = arith.constant 0 : index
    %c0_2 = arith.constant 0 : index
    %1 = vector.load %arg3[%c0_1, %c0_2] : memref<128x128xbf16, #tpu.memory_space<vmem>>, vector<128x128xbf16>
    %cst = arith.constant dense<0.000000e+00> : vector<128x128xf32>
    %2 = tpu.matmul %0, %1, %cst {dimension_numbers = #tpu.dot_dimension_numbers<[1], [0], [0], [1], [0, 0, 1, 1], [], []>} : vector<128x128xbf16>, vector<128x128xbf16>, vector<128x128xf32> -> vector<128x128xf32>
    %c0_3 = arith.constant 0 : index
    %c0_4 = arith.constant 0 : index
    %3 = vector.load %arg2[%c0_3, %c0_4] : memref<128x1xf32, #tpu.memory_space<vmem>>, vector<128x1xf32>
    %4 = vector.broadcast %3 : vector<128x1xf32> to vector<128x128xf32>
    %5 = arith.mulf %4, %2 : vector<128x128xf32>
    %6 = arith.truncf %5 : vector<128x128xf32> to vector<128x128xbf16>
    %c0_5 = arith.constant 0 : index
    %c0_6 = arith.constant 0 : index
    %7 = vector.load %arg4[%c0_5, %c0_6] : memref<128x128xbf16, #tpu.memory_space<vmem>>, vector<128x128xbf16>
    tpu.vector_store %arg4[%c0_5, %c0_6], %6 {strides = array<i32>} : memref<128x128xbf16, #tpu.memory_space<vmem>>, vector<128x128xbf16>,
    return
  }
  func.func @transform_0(%arg0: i32) -> (i32, i32) {
    %c0_i32 = arith.constant 0 : i32
    %c0_i32_0 = arith.constant 0 : i32
    return %arg0, %c0_i32 : i32, i32
  }
  func.func @transform_1(%arg0: i32) -> (i32, i32) {
    %c0_i32 = arith.constant 0 : i32
    %c0_i32_0 = arith.constant 0 : i32
    return %arg0, %c0_i32 : i32, i32
  }
  func.func @transform_2(%arg0: i32) -> (i32, i32) {
    %c0_i32 = arith.constant 0 : i32
    %c0_i32_0 = arith.constant 0 : i32
    %c0_i32_1 = arith.constant 0 : i32
    return %c0_i32, %c0_i32_0 : i32, i32
  }
  func.func @transform_3(%arg0: i32) -> (i32, i32) {
    %c0_i32 = arith.constant 0 : i32
    %c0_i32_0 = arith.constant 0 : i32
    return %arg0, %c0_i32 : i32, i32
  }
}

module attributes {stable_mosaic.version = 11 : i64} {
  func.func @_aggregate_kernel(%arg0: i32, %arg1: i32, %arg2: memref<1xi32, #tpu.memory_space<smem>>, %arg3: memref<1xi32, #tpu.memory_space<smem>>, %arg4: memref<128x128xbf16, #tpu.memory_space<vmem>>, %arg5: memref<128x128xbf16, #tpu.memory_space<vmem>>, %arg6: memref<128x1xf32, #tpu.memory_space<vmem>>, %arg7: memref<1x128xf32, #tpu.memory_space<vmem>>, %arg8: memref<128x128xf32, #tpu.memory_space<vmem>>) attributes {dimension_semantics = [#tpu.dimension_semantics<parallel>, #tpu.dimension_semantics<arbitrary>], iteration_bounds = array<i64: 1, 1>, scalar_prefetch = 2 : i64, scratch_operands = 0 : i64, tpu.core_type = #tpu.core_type<tc>, window_params = [{transform_indices = @transform_0, window_bounds = array<i64: 128, 128>}, {transform_indices = @transform_1, window_bounds = array<i64: 128, 128>}, {transform_indices = @transform_2, window_bounds = array<i64: 128, 1>}, {pipeline_mode = #tpu.pipeline_mode<synchronous>, transform_indices = @transform_3, window_bounds = array<i64: 1, 128>}, {transform_indices = @transform_4, window_bounds = array<i64: 128, 128>}]} {
    %c0_i32 = arith.constant 0 : i32
    %0 = arith.cmpi eq, %arg1, %c0_i32 : i32
    %1 = arith.extui %0 : i1 to i32
    %c0_i32_0 = arith.constant 0 : i32
    %2 = arith.cmpi ne, %1, %c0_i32_0 : i32
    scf.if %2 {
      %cst = arith.constant 0.000000e+00 : f32
      %13 = vector.broadcast %cst : f32 to vector<128x128xf32>
      %c0 = arith.constant 0 : index
      %c0_5 = arith.constant 0 : index
      %14 = vector.load %arg8[%c0, %c0_5] : memref<128x128xf32, #tpu.memory_space<vmem>>, vector<128x128xf32>
      tpu.vector_store %arg8[%c0, %c0_5], %13 {strides = array<i32>} : memref<128x128xf32, #tpu.memory_space<vmem>>, vector<128x128xf32>,
    } else {
    }
    %c1_i32 = arith.constant 1 : i32
    %3 = arith.muli %arg0, %c1_i32 : i32
    %4 = arith.addi %3, %arg1 : i32
    %5 = arith.index_cast %4 : i32 to index
    %6 = memref.load %arg2[%5] : memref<1xi32, #tpu.memory_space<smem>>
    %c0_i32_1 = arith.constant 0 : i32
    %7 = arith.cmpi sgt, %6, %c0_i32_1 : i32
    %8 = arith.extui %7 : i1 to i32
    %c0_i32_2 = arith.constant 0 : i32
    %9 = arith.cmpi ne, %8, %c0_i32_2 : i32
    scf.if %9 {
      %c0 = arith.constant 0 : index
      %c0_5 = arith.constant 0 : index
      %13 = vector.load %arg8[%c0, %c0_5] : memref<128x128xf32, #tpu.memory_space<vmem>>, vector<128x128xf32>
      %c0_6 = arith.constant 0 : index
      %c0_7 = arith.constant 0 : index
      %14 = vector.load %arg4[%c0_6, %c0_7] : memref<128x128xbf16, #tpu.memory_space<vmem>>, vector<128x128xbf16>
      %c0_8 = arith.constant 0 : index
      %c0_9 = arith.constant 0 : index
      %15 = vector.load %arg5[%c0_8, %c0_9] : memref<128x128xbf16, #tpu.memory_space<vmem>>, vector<128x128xbf16>
      %cst = arith.constant dense<0.000000e+00> : vector<128x128xf32>
      %16 = tpu.matmul %14, %15, %cst {dimension_numbers = #tpu.dot_dimension_numbers<[1], [0], [0], [1], [0, 0, 1, 1], [], []>} : vector<128x128xbf16>, vector<128x128xbf16>, vector<128x128xf32> -> vector<128x128xf32>
      %17 = arith.addf %13, %16 : vector<128x128xf32>
      %c0_10 = arith.constant 0 : index
      %c0_11 = arith.constant 0 : index
      %18 = vector.load %arg8[%c0_10, %c0_11] : memref<128x128xf32, #tpu.memory_space<vmem>>, vector<128x128xf32>
      tpu.vector_store %arg8[%c0_10, %c0_11], %17 {strides = array<i32>} : memref<128x128xf32, #tpu.memory_space<vmem>>, vector<128x128xf32>,
    } else {
    }
    %c0_i32_3 = arith.constant 0 : i32
    %10 = arith.cmpi eq, %arg1, %c0_i32_3 : i32
    %11 = arith.extui %10 : i1 to i32
    %c0_i32_4 = arith.constant 0 : i32
    %12 = arith.cmpi ne, %11, %c0_i32_4 : i32
    scf.if %12 {
      %c0 = arith.constant 0 : index
      %c0_5 = arith.constant 0 : index
      %13 = vector.load %arg6[%c0, %c0_5] : memref<128x1xf32, #tpu.memory_space<vmem>>, vector<128x1xf32>
      %c0_6 = arith.constant 0 : index
      %c0_7 = arith.constant 0 : index
      %14 = vector.load %arg8[%c0_6, %c0_7] : memref<128x128xf32, #tpu.memory_space<vmem>>, vector<128x128xf32>
      %15 = vector.broadcast %13 : vector<128x1xf32> to vector<128x128xf32>
      %16 = arith.mulf %15, %14 : vector<128x128xf32>
      %c0_8 = arith.constant 0 : index
      %c0_9 = arith.constant 0 : index
      %17 = vector.load %arg7[%c0_8, %c0_9] : memref<1x128xf32, #tpu.memory_space<vmem>>, vector<1x128xf32>
      %18 = vector.broadcast %17 : vector<1x128xf32> to vector<128x128xf32>
      %19 = arith.addf %16, %18 : vector<128x128xf32>
      %c0_10 = arith.constant 0 : index
      %c0_11 = arith.constant 0 : index
      %20 = vector.load %arg8[%c0_10, %c0_11] : memref<128x128xf32, #tpu.memory_space<vmem>>, vector<128x128xf32>
      tpu.vector_store %arg8[%c0_10, %c0_11], %19 {strides = array<i32>} : memref<128x128xf32, #tpu.memory_space<vmem>>, vector<128x128xf32>,
    } else {
    }
    return
  }
  func.func @transform_0(%arg0: i32, %arg1: i32, %arg2: memref<1xi32, #tpu.memory_space<smem>>, %arg3: memref<1xi32, #tpu.memory_space<smem>>) -> (i32, i32) {
    %c1_i32 = arith.constant 1 : i32
    %0 = arith.muli %arg0, %c1_i32 : i32
    %1 = arith.addi %0, %arg1 : i32
    %2 = arith.index_cast %1 : i32 to index
    %3 = memref.load %arg3[%2] : memref<1xi32, #tpu.memory_space<smem>>
    %c0_i32 = arith.constant 0 : i32
    return %arg0, %3 : i32, i32
  }
  func.func @transform_1(%arg0: i32, %arg1: i32, %arg2: memref<1xi32, #tpu.memory_space<smem>>, %arg3: memref<1xi32, #tpu.memory_space<smem>>) -> (i32, i32) {
    %c1_i32 = arith.constant 1 : i32
    %0 = arith.muli %arg0, %c1_i32 : i32
    %1 = arith.addi %0, %arg1 : i32
    %2 = arith.index_cast %1 : i32 to index
    %3 = memref.load %arg3[%2] : memref<1xi32, #tpu.memory_space<smem>>
    %c0_i32 = arith.constant 0 : i32
    %c0_i32_0 = arith.constant 0 : i32
    return %3, %c0_i32 : i32, i32
  }
  func.func @transform_2(%arg0: i32, %arg1: i32, %arg2: memref<1xi32, #tpu.memory_space<smem>>, %arg3: memref<1xi32, #tpu.memory_space<smem>>) -> (i32, i32) {
    %c0_i32 = arith.constant 0 : i32
    %c0_i32_0 = arith.constant 0 : i32
    return %arg0, %c0_i32 : i32, i32
  }
  func.func @transform_3(%arg0: i32, %arg1: i32, %arg2: memref<1xi32, #tpu.memory_space<smem>>, %arg3: memref<1xi32, #tpu.memory_space<smem>>) -> (i32, i32) {
    %c0_i32 = arith.constant 0 : i32
    %c0_i32_0 = arith.constant 0 : i32
    %c0_i32_1 = arith.constant 0 : i32
    return %c0_i32, %c0_i32_0 : i32, i32
  }
  func.func @transform_4(%arg0: i32, %arg1: i32, %arg2: memref<1xi32, #tpu.memory_space<smem>>, %arg3: memref<1xi32, #tpu.memory_space<smem>>) -> (i32, i32) {
    %c0_i32 = arith.constant 0 : i32
    %c0_i32_0 = arith.constant 0 : i32
    return %arg0, %c0_i32 : i32, i32
  }
}

</mosaic_0001>

<bundles_post_ra>
// kernel: gcn_forward.4
= control target key start
LH: loop header
LB: loop body
LE: loop exit
PB: predicated region body
PF: predicated region fallthrough
CT: control target
= control target key end

     0   :  { %v1216_v0 = vmov 0.0   ;;  %s1445_s0 = inlined_call_operand.<no memory space> [shape: s32[1], index: 0, kind: input, shape index: {}]   ;;  %s1446_s1 = inlined_call_operand.<no memory space> [shape: s32[1], index: 1, kind: input, shape index: {}]   ;;  %s1447_s4 = inlined_call_operand.vmem [shape: f32[128,1], index: 4, kind: input, shape index: {}]   ;;  %s1448_s5 = inlined_call_operand.vmem [shape: f32[1,128], index: 5, kind: input, shape index: {}]   ;;  %s1449_s6 = inlined_call_operand.vmem [shape: bf16[128,128], index: 6, kind: input, shape index: {}]   ;;  %s1450_s7 = inlined_call_operand.vmem [shape: bf16[128,128], index: 7, kind: output, shape index: {}]   ;;  %s1451_s2 = inlined_call_operand.vmem [shape: bf16[128,128], index: 2, kind: input, shape index: {}]   ;;  %s1452_s3 = inlined_call_operand.vmem [shape: bf16[128,128], index: 3, kind: input, shape index: {}]  }
   0x1   :  { %p57_p0 = scmp.lt.s32.totalorder %s1446_s1, 0  ;;  %s953_s28 = sshll.u32 %s1446_s1, 4  ;;  %78 = vst [vmem:[#allocation2] sm:$0xff] %v1216_v0  ;;  %79 = vst [vmem:[#allocation2 + $0x8] sm:$0xff] %v1216_v0 }
   0x2   :  { %80 = vst [vmem:[#allocation2 + $0x10] sm:$0xff] %v1216_v0  ;;  %81 = vst [vmem:[#allocation2 + $0x18] sm:$0xff] %v1216_v0  ;;  %p66_p1 = scmp.lt.s32.totalorder %s953_s28, 15  ;;  %p955_p2 = scmp.le.s32.totalorder %s1445_s0, 0 }
   0x3   :  { %82 = vst [vmem:[#allocation2 + $0x20] sm:$0xff] %v1216_v0  ;;  %83 = vst [vmem:[#allocation2 + $0x28] sm:$0xff] %v1216_v0  ;;  %s1454_s1 = smov (!%p57_p0, %s1446_s1), 0 }
   0x4   :  { %84 = vst [vmem:[#allocation2 + $0x30] sm:$0xff] %v1216_v0  ;;  %85 = vst [vmem:[#allocation2 + $0x38] sm:$0xff] %v1216_v0  ;;  %s1456_s28 = smov (!%p66_p1, %s953_s28), 15  ;;  %s952_s10 = sshll.u32 %s1454_s1, 2 }
   0x5   :  { %86 = vst [vmem:[#allocation2 + $0x40] sm:$0xff] %v1216_v0  ;;  %87 = vst [vmem:[#allocation2 + $0x48] sm:$0xff] %v1216_v0  ;;  %s1274_s13 = scalar_lea.vmem %s1451_s2, %s952_s10  ;;  %s954_s14 = sshll.u32 %s1456_s28, 2 }
   0x6   :  { %88 = vst [vmem:[#allocation2 + $0x50] sm:$0xff] %v1216_v0  ;;  %89 = vst [vmem:[#allocation2 + $0x58] sm:$0xff] %v1216_v0  ;;  %s1279_s17 = scalar_lea.vmem %s1452_s3, %s954_s14  ;;  %99 = sbr.rel (%p955_p2) target bundleno = 266 (0x10a), region = 29  ;;  %v1198_v5 = vld [vmem:[%s1274_s13] sm:$0xff] (!%p955_p2)   ;;  %v1200_v11 = vld [vmem:[%s1274_s13 + $0x8] sm:$0xff] (!%p955_p2)  }
   0x7   :  { %90 = vst [vmem:[#allocation2 + $0x60] sm:$0xff] %v1216_v0  ;;  %91 = vst [vmem:[#allocation2 + $0x68] sm:$0xff] %v1216_v0  ;;  %v1190_v1 = vld [vmem:[%s1279_s17] sm:$0xff] (!%p955_p2)   ;;  %v1191_v2 = vld [vmem:[%s1279_s17 + $0x8] sm:$0xff] (!%p955_p2)   ;;  %1108 = vmatprep.mubr.bf16.mxu0 (!%p955_p2), %v1198_v5 }
   0x8   :  { %92 = vst [vmem:[#allocation2 + $0x70] sm:$0xff] %v1216_v0  ;;  %93 = vst [vmem:[#allocation2 + $0x78] sm:$0xff] %v1216_v0  ;;  %1092 = vmatprep.subr.bf16.mxu0 (!%p955_p2), %v1190_v1  ;;  %1156 = vmatprep.subr.bf16.mxu1 (!%p955_p2), %v1190_v1  ;;  %v1192_v3 = vld [vmem:[%s1279_s17 + $0x10] sm:$0xff] (!%p955_p2)   ;;  %v1193_v4 = vld [vmem:[%s1279_s17 + $0x18] sm:$0xff] (!%p955_p2)  }
   0x9   :  { %1093 = vmatpush3.bf16.msra.mxu0 (!%p955_p2), %v1190_v1  ;;  %1164 = vmatpush3.bf16.msra.mxu1 (!%p955_p2), %v1190_v1  ;;  %v1199_v6 = vld [vmem:[%s1274_s13 + $0x20] sm:$0xff] (!%p955_p2)   ;;  %v1195_v8 = vld [vmem:[%s1279_s17 + $0x28] sm:$0xff] (!%p955_p2)   ;;  %v1196_v9 = vld [vmem:[%s1279_s17 + $0x30] sm:$0xff] (!%p955_p2)  }
   0xa   :  { %1094 = vmatprep.subr.bf16.mxu0 (!%p955_p2), %v1191_v2  ;;  %1157 = vmatprep.subr.bf16.mxu1 (!%p955_p2), %v1191_v2  ;;  %v1194_v7 = vld [vmem:[%s1279_s17 + $0x20] sm:$0xff] (!%p955_p2)   ;;  %v1197_v10 = vld [vmem:[%s1279_s17 + $0x38] sm:$0xff] (!%p955_p2)   ;;  %v1201_v12 = vld [vmem:[%s1274_s13 + $0x28] sm:$0xff] (!%p955_p2)  }
   0xb   :  { %1116 = vmatprep.mubr.bf16.mxu1 (!%p955_p2), %v1199_v6  ;;  %v1202_v13 = vld [vmem:[%s1274_s13 + $0x10] sm:$0xff] (!%p955_p2)   ;;  %v1204_v15 = vld [vmem:[%s1274_s13 + $0x18] sm:$0xff] (!%p955_p2)   ;;  %v100_v19 = vld [vmem:[#allocation2] sm:$0xff] (!%p955_p2) }
   0xc   :  { %v1203_v14 = vld [vmem:[%s1274_s13 + $0x30] sm:$0xff] (!%p955_p2)   ;;  %v1205_v16 = vld [vmem:[%s1274_s13 + $0x38] sm:$0xff] (!%p955_p2)   ;;  %v108_v20 = vld [vmem:[#allocation2 + $0x40] sm:$0xff] (!%p955_p2) }
   0xd   :  { %1095 = vmatpush3.bf16.msra.mxu0 %v1191_v2  ;;  %1165 = vmatpush3.bf16.msra.mxu1 %v1191_v2  ;;  %v102_v17 = vld [vmem:[#allocation2 + $0x10] sm:$0xff]  ;;  %v103_v23 = vld [vmem:[#allocation2 + $0x18] sm:$0xff]  ;;  %v101_v29 = vld [vmem:[#allocation2 + $0x8] sm:$0xff] }
   0xe   :  { %1096 = vmatprep.subr.bf16.mxu0 %v1192_v3  ;;  %1158 = vmatprep.subr.bf16.mxu1 %v1192_v3  ;;  %v110_v18 = vld [vmem:[#allocation2 + $0x50] sm:$0xff]  ;;  %v111_v24 = vld [vmem:[#allocation2 + $0x58] sm:$0xff]  ;;  %v109_v30 = vld [vmem:[#allocation2 + $0x48] sm:$0xff] }
   0xf   :  { %v106_v41 = vld [vmem:[#allocation2 + $0x30] sm:$0xff]  ;;  %v104_v43 = vld [vmem:[#allocation2 + $0x20] sm:$0xff]  ;;  %v107_v47 = vld [vmem:[#allocation2 + $0x38] sm:$0xff] }
  0x10   :  { %v114_v42 = vld [vmem:[#allocation2 + $0x70] sm:$0xff]  ;;  %v112_v44 = vld [vmem:[#allocation2 + $0x60] sm:$0xff]  ;;  %v115_v48 = vld [vmem:[#allocation2 + $0x78] sm:$0xff] }
  0x11   :  { %1097 = vmatpush3.bf16.msra.mxu0 %v1192_v3  ;;  %1166 = vmatpush3.bf16.msra.mxu1 %v1192_v3  ;;  %v105_v53 = vld [vmem:[#allocation2 + $0x28] sm:$0xff] }
  0x12   :  { %1098 = vmatprep.subr.bf16.mxu0 %v1193_v4  ;;  %1159 = vmatprep.subr.bf16.mxu1 %v1193_v4  ;;  %v113_v54 = vld [vmem:[#allocation2 + $0x68] sm:$0xff] }
  0x15   :  { %1099 = vmatpush3.bf16.msra.mxu0 %v1193_v4  ;;  %1167 = vmatpush3.bf16.msra.mxu1 %v1193_v4 }
  0x16   :  { %1100 = vmatprep.subr.bf16.mxu0 %v1194_v7  ;;  %1160 = vmatprep.subr.bf16.mxu1 %v1194_v7 }
  0x19   :  { %1101 = vmatpush3.bf16.msra.mxu0 %v1194_v7  ;;  %1168 = vmatpush3.bf16.msra.mxu1 %v1194_v7 }
  0x1a   :  { %1102 = vmatprep.subr.bf16.mxu0 %v1195_v8  ;;  %1161 = vmatprep.subr.bf16.mxu1 %v1195_v8 }
  0x1d   :  { %1103 = vmatpush3.bf16.msra.mxu0 %v1195_v8  ;;  %1169 = vmatpush3.bf16.msra.mxu1 %v1195_v8 }
  0x1e   :  { %1104 = vmatprep.subr.bf16.mxu0 %v1196_v9  ;;  %1162 = vmatprep.subr.bf16.mxu1 %v1196_v9 }
  0x21   :  { %1105 = vmatpush3.bf16.msra.mxu0 %v1196_v9  ;;  %1170 = vmatpush3.bf16.msra.mxu1 %v1196_v9 }
  0x22   :  { %1106 = vmatprep.subr.bf16.mxu0 %v1197_v10  ;;  %1163 = vmatprep.subr.bf16.mxu1 %v1197_v10 }
  0x25   :  { %1107 = vmatpush3.bf16.msra.mxu0 %v1197_v10  ;;  %1171 = vmatpush3.bf16.msra.mxu1 %v1197_v10 }
  0x28   :  { %1109 = vmatmul.mubr.bf16.vlgmr.msra.gmra.mrb[0].mxu0 %v1200_v11  ;;  %1117 = vmatmul.mubr.bf16.vlgmr.msra.gmra.mrb[0].mxu1 %v1201_v12 }
  0x29   :  { %1112 = vmatprep.mubr.bf16.mxu0 %v1202_v13  ;;  %1120 = vmatprep.mubr.bf16.mxu1 %v1203_v14 }
  0x30   :  { %1113 = vmatmul.mubr.bf16.gmra.mrb[4].mxu0 %v1204_v15  ;;  %1121 = vmatmul.mubr.bf16.gmra.mrb[4].mxu1 %v1205_v16 }
  0xfb   :  { %v1110_v21 = vpop.f32.mrb[0].mxu0  ;;  %v1118_v22 = vpop.f32.mrb[0].mxu1 }
  0xfc   :  { %v343_v25 = vadd.f32 %v1110_v21, %v102_v17  ;;  %v351_v26 = vadd.f32 %v1118_v22, %v110_v18  ;;  %v278_v27 = vpop.f32.mrb[1].mxu0  ;;  %v310_v28 = vpop.f32.mrb[1].mxu1 }
  0xfd   :  { %v341_v31 = vadd.f32 %v278_v27, %v100_v19  ;;  %v349_v32 = vadd.f32 %v310_v28, %v108_v20  ;;  %v1111_v33 = vpop.f32.mrb[2].mxu0  ;;  %v1119_v34 = vpop.f32.mrb[2].mxu1 }
  0xfe   :  { %359 = vst [vmem:[#allocation2 + $0x10] sm:$0xff] %v343_v25  ;;  %367 = vst [vmem:[#allocation2 + $0x50] sm:$0xff] %v351_v26  ;;  %v344_v35 = vadd.f32 %v1111_v33, %v103_v23  ;;  %v352_v36 = vadd.f32 %v1119_v34, %v111_v24  ;;  %v281_v37 = vpop.f32.mrb[3].mxu0  ;;  %v313_v38 = vpop.f32.mrb[3].mxu1 }
  0xff   :  { %357 = vst [vmem:[#allocation2] sm:$0xff] %v341_v31  ;;  %365 = vst [vmem:[#allocation2 + $0x40] sm:$0xff] %v349_v32  ;;  %v342_v39 = vadd.f32 %v281_v37, %v101_v29  ;;  %v350_v40 = vadd.f32 %v313_v38, %v109_v30 }
 0x100   :  { %360 = vst [vmem:[#allocation2 + $0x18] sm:$0xff] %v344_v35  ;;  %368 = vst [vmem:[#allocation2 + $0x58] sm:$0xff] %v352_v36 }
 0x101   :  { %358 = vst [vmem:[#allocation2 + $0x8] sm:$0xff] %v342_v39  ;;  %366 = vst [vmem:[#allocation2 + $0x48] sm:$0xff] %v350_v40 }
 0x103   :  { %v1114_v45 = vpop.f32.mrb[4].mxu0  ;;  %v1122_v46 = vpop.f32.mrb[4].mxu1 }
 0x104   :  { %v347_v49 = vadd.f32 %v1114_v45, %v106_v41  ;;  %v355_v50 = vadd.f32 %v1122_v46, %v114_v42  ;;  %v294_v51 = vpop.f32.mrb[5].mxu0  ;;  %v326_v52 = vpop.f32.mrb[5].mxu1 }
 0x105   :  { %v345_v55 = vadd.f32 %v294_v51, %v104_v43  ;;  %v353_v56 = vadd.f32 %v326_v52, %v112_v44  ;;  %v1115_v57 = vpop.f32.mrb[6].mxu0  ;;  %v1123_v58 = vpop.f32.mrb[6].mxu1 }
 0x106   :  { %363 = vst [vmem:[#allocation2 + $0x30] sm:$0xff] %v347_v49  ;;  %371 = vst [vmem:[#allocation2 + $0x70] sm:$0xff] %v355_v50  ;;  %v348_v59 = vadd.f32 %v1115_v57, %v107_v47  ;;  %v356_v60 = vadd.f32 %v1123_v58, %v115_v48  ;;  %v297_v61 = vpop.f32.mrb[7].mxu0  ;;  %v329_v62 = vpop.f32.mrb[7].mxu1 }
 0x107   :  { %361 = vst [vmem:[#allocation2 + $0x20] sm:$0xff] %v345_v55  ;;  %369 = vst [vmem:[#allocation2 + $0x60] sm:$0xff] %v353_v56  ;;  %v346_v63 = vadd.f32 %v297_v61, %v105_v53  ;;  %v354_v0 = vadd.f32 %v329_v62, %v113_v54 }
 0x108   :  { %364 = vst [vmem:[#allocation2 + $0x38] sm:$0xff] %v348_v59  ;;  %372 = vst [vmem:[#allocation2 + $0x78] sm:$0xff] %v356_v60 }
 0x109   :  { %362 = vst [vmem:[#allocation2 + $0x28] sm:$0xff] %v346_v63  ;;  %370 = vst [vmem:[#allocation2 + $0x68] sm:$0xff] %v354_v0 }
 0x10a PF:  { %v1303_v1 = vld [vmem:[%s1447_s4 + $0x40] sm:$0xff]  ;;  %v1217_v3 = vmov 0   ;;  %v1315_v4 = vld [vmem:[%s1447_s4 + $0x48] sm:$0xff]  ;;  %v1327_v7 = vld [vmem:[%s1447_s4 + $0x18] sm:$0xff] }
 0x10b   :  { %v1308_v2 = vld [vmem:[%s1447_s4] sm:$0xff]  ;;  %1207 = vset.pattern.permute.xlu1 %v1217_v3  ;;  %1206 = vset.pattern.permute.xlu0 %v1217_v3  ;;  %v377_v5 = vld [vmem:[%s1447_s4 + $0x8] sm:$0xff]  ;;  %v1332_v8 = vld [vmem:[%s1447_s4 + $0x10] sm:$0xff] }
 0x10c   :  { %450 = vperm.xlu1 %1207, %v1303_v1   ;;  %410 = vperm.xlu0 %1206, %v1308_v2   ;;  %v1208_v6 = vld [vmem:[%s1449_s6] sm:$0xff]   ;;  %v1209_v9 = vld [vmem:[%s1449_s6 + $0x8] sm:$0xff]   ;;  %v1342_v10 = vld [vmem:[%s1447_s4 + $0x58] sm:$0xff] }
 0x10d   :  { %1124 = vmatprep.subr.bf16.mxu0 %v1208_v6  ;;  %1172 = vmatprep.subr.bf16.mxu1 %v1208_v6  ;;  %v1347_v11 = vld [vmem:[%s1447_s4 + $0x50] sm:$0xff]  ;;  %v381_v13 = vld [vmem:[%s1447_s4 + $0x28] sm:$0xff]  ;;  %v380_v14 = vld [vmem:[%s1447_s4 + $0x20] sm:$0xff] }
 0x10e   :  { %1125 = vmatpush3.bf16.msra.mxu0 %v1208_v6  ;;  %1180 = vmatpush3.bf16.msra.mxu1 %v1208_v6  ;;  %v1210_v12 = vld [vmem:[%s1449_s6 + $0x10] sm:$0xff]   ;;  %v1211_v15 = vld [vmem:[%s1449_s6 + $0x18] sm:$0xff]   ;;  %v389_v16 = vld [vmem:[%s1447_s4 + $0x68] sm:$0xff] }
 0x10f   :  { %1126 = vmatprep.subr.bf16.mxu0 %v1209_v9  ;;  %1173 = vmatprep.subr.bf16.mxu1 %v1209_v9  ;;  %v388_v17 = vld [vmem:[%s1447_s4 + $0x60] sm:$0xff]  ;;  %v383_v19 = vld [vmem:[%s1447_s4 + $0x38] sm:$0xff]  ;;  %v382_v20 = vld [vmem:[%s1447_s4 + $0x30] sm:$0xff] }
 0x110   :  { %455 = vperm.xlu1 %1207, %v1315_v4   ;;  %415 = vperm.xlu0 %1206, %v377_v5   ;;  %v1212_v18 = vld [vmem:[%s1449_s6 + $0x20] sm:$0xff]   ;;  %v1213_v21 = vld [vmem:[%s1449_s6 + $0x28] sm:$0xff]   ;;  %v391_v22 = vld [vmem:[%s1447_s4 + $0x78] sm:$0xff] }
 0x111   :  { %v390_v23 = vld [vmem:[%s1447_s4 + $0x70] sm:$0xff]  ;;  %v1215_v25 = vld [vmem:[%s1449_s6 + $0x38] sm:$0xff]   ;;  %v400_v26 = vld [vmem:[#allocation2 + $0x40] sm:$0xff] }
 0x112   :  { %1127 = vmatpush3.bf16.msra.mxu0 %v1209_v9  ;;  %1181 = vmatpush3.bf16.msra.mxu1 %v1209_v9  ;;  %v1214_v24 = vld [vmem:[%s1449_s6 + $0x30] sm:$0xff]   ;;  %v392_v27 = vld [vmem:[#allocation2] sm:$0xff]  ;;  %v401_v33 = vld [vmem:[#allocation2 + $0x48] sm:$0xff] }
 0x113   :  { %1128 = vmatprep.subr.bf16.mxu0 %v1210_v12  ;;  %1174 = vmatprep.subr.bf16.mxu1 %v1210_v12  ;;  %v1403_v28 = vld [vmem:[%s1448_s5] ss:$0 sm:$0xff]  ;;  %v393_v34 = vld [vmem:[#allocation2 + $0x8] sm:$0xff]  ;;  %v395_v43 = vld [vmem:[#allocation2 + $0x18] sm:$0xff] }
 0x114   :  { %425 = vperm.xlu1 %1207, %v1327_v7   ;;  %420 = vperm.xlu0 %1206, %v1332_v8   ;;  %v394_v44 = vld [vmem:[#allocation2 + $0x10] sm:$0xff]  ;;  %v403_v53 = vld [vmem:[#allocation2 + $0x58] sm:$0xff] }
 0x115   :  { %v402_v54 = vld [vmem:[#allocation2 + $0x50] sm:$0xff] }
 0x116   :  { %1129 = vmatpush3.bf16.msra.mxu0 %v1210_v12  ;;  %1182 = vmatpush3.bf16.msra.mxu1 %v1210_v12  ;;  %v405_v12 = vld [vmem:[#allocation2 + $0x68] sm:$0xff] }
 0x117   :  { %1130 = vmatprep.subr.bf16.mxu0 %v1211_v15  ;;  %1175 = vmatprep.subr.bf16.mxu1 %v1211_v15 }
 0x118   :  { %465 = vperm.xlu1 %1207, %v1342_v10   ;;  %460 = vperm.xlu0 %1206, %v1347_v11  }
 0x11a   :  { %1131 = vmatpush3.bf16.msra.mxu0 %v1211_v15  ;;  %1183 = vmatpush3.bf16.msra.mxu1 %v1211_v15 }
 0x11b   :  { %1132 = vmatprep.subr.bf16.mxu0 %v1212_v18  ;;  %1176 = vmatprep.subr.bf16.mxu1 %v1212_v18 }
 0x11c   :  { %435 = vperm.xlu1 %1207, %v381_v13   ;;  %430 = vperm.xlu0 %1206, %v380_v14  }
 0x11e   :  { %1133 = vmatpush3.bf16.msra.mxu0 %v1212_v18  ;;  %1184 = vmatpush3.bf16.msra.mxu1 %v1212_v18 }
 0x11f   :  { %1134 = vmatprep.subr.bf16.mxu0 %v1213_v21  ;;  %1177 = vmatprep.subr.bf16.mxu1 %v1213_v21 }
 0x120   :  { %475 = vperm.xlu1 %1207, %v389_v16   ;;  %470 = vperm.xlu0 %1206, %v388_v17  }
 0x122   :  { %1135 = vmatpush3.bf16.msra.mxu0 %v1213_v21  ;;  %1185 = vmatpush3.bf16.msra.mxu1 %v1213_v21 }
 0x123   :  { %1136 = vmatprep.subr.bf16.mxu0 %v1214_v24  ;;  %1178 = vmatprep.subr.bf16.mxu1 %v1214_v24 }
 0x124   :  { %445 = vperm.xlu1 %1207, %v383_v19   ;;  %440 = vperm.xlu0 %1206, %v382_v20  }
 0x126   :  { %1137 = vmatpush3.bf16.msra.mxu0 %v1214_v24  ;;  %1186 = vmatpush3.bf16.msra.mxu1 %v1214_v24  ;;  %v398_v24 = vld [vmem:[#allocation2 + $0x30] sm:$0xff] }
 0x127   :  { %1138 = vmatprep.subr.bf16.mxu0 %v1215_v25  ;;  %1179 = vmatprep.subr.bf16.mxu1 %v1215_v25 }
 0x128   :  { %485 = vperm.xlu1 %1207, %v391_v22   ;;  %480 = vperm.xlu0 %1206, %v390_v23  }
 0x12a   :  { %1139 = vmatpush3.bf16.msra.mxu0 %v1215_v25  ;;  %1187 = vmatpush3.bf16.msra.mxu1 %v1215_v25 }
 0x12c   :  { %767 = vperm.xlu1 %1207, %v377_v5   ;;  %762 = vperm.xlu0 %1206, %v1308_v2   ;;  %v396_v2 = vld [vmem:[#allocation2 + $0x20] sm:$0xff] }
 0x130   :  { %777 = vperm.xlu1 %1207, %v1327_v7   ;;  %772 = vperm.xlu0 %1206, %v1332_v8  }
 0x134   :  { %787 = vperm.xlu1 %1207, %v381_v13   ;;  %782 = vperm.xlu0 %1206, %v380_v14   ;;  %v404_v13 = vld [vmem:[#allocation2 + $0x60] sm:$0xff] }
 0x138   :  { %797 = vperm.xlu1 %1207, %v383_v19   ;;  %792 = vperm.xlu0 %1206, %v382_v20  }
 0x13c   :  { %807 = vperm.xlu1 %1207, %v1315_v4   ;;  %802 = vperm.xlu0 %1206, %v1303_v1   ;;  %v397_v1 = vld [vmem:[#allocation2 + $0x28] sm:$0xff] }
 0x140   :  { %817 = vperm.xlu1 %1207, %v1342_v10   ;;  %812 = vperm.xlu0 %1206, %v1347_v11  }
 0x144   :  { %827 = vperm.xlu1 %1207, %v389_v16   ;;  %822 = vperm.xlu0 %1206, %v388_v17  }
 0x148   :  { %837 = vperm.xlu1 %1207, %v391_v22   ;;  %832 = vperm.xlu0 %1206, %v390_v23   ;;  %v399_v23 = vld [vmem:[#allocation2 + $0x38] sm:$0xff] }
 0x18b   :  { %v451_v29 = vpop.permute.xlu1 %450  ;;  %v411_v30 = vpop.permute.xlu0 %410 }
 0x18c   :  { %v496_v31 = vmul.f32 %v451_v29, %v400_v26  ;;  %v488_v32 = vmul.f32 %v411_v30, %v392_v27 }
 0x18e   :  { %v519_v35 = vadd.f32 %v1403_v28, %v496_v31  ;;  %v511_v36 = vadd.f32 %v1403_v28, %v488_v32 }
 0x18f   :  { %v456_v37 = vpop.permute.xlu1 %455  ;;  %v416_v38 = vpop.permute.xlu0 %415 }
 0x190   :  { %v535_v39 = vmax.f32 %v519_v35, 0.0  ;;  %v527_v40 = vmax.f32 %v511_v36, 0.0  ;;  %v497_v41 = vmul.f32 %v456_v37, %v401_v33  ;;  %v489_v42 = vmul.f32 %v416_v38, %v393_v34  ;;  %v407_v35 = vld [vmem:[#allocation2 + $0x78] sm:$0xff]  ;;  %v406_v36 = vld [vmem:[#allocation2 + $0x70] sm:$0xff] }
 0x192   :  { %551 = vst [vmem:[#allocation2 + $0x40] sm:$0xff] %v535_v39  ;;  %543 = vst [vmem:[#allocation2] sm:$0xff] %v527_v40  ;;  %v520_v45 = vadd.f32 %v1403_v28, %v497_v41  ;;  %v512_v46 = vadd.f32 %v1403_v28, %v489_v42 }
 0x193   :  { %v426_v47 = vpop.permute.xlu1 %425  ;;  %v421_v48 = vpop.permute.xlu0 %420 }
 0x194   :  { %v536_v49 = vmax.f32 %v520_v45, 0.0  ;;  %v528_v50 = vmax.f32 %v512_v46, 0.0  ;;  %v491_v51 = vmul.f32 %v426_v47, %v395_v43  ;;  %v490_v52 = vmul.f32 %v421_v48, %v394_v44 }
 0x196   :  { %552 = vst [vmem:[#allocation2 + $0x48] sm:$0xff] %v536_v49  ;;  %544 = vst [vmem:[#allocation2 + $0x8] sm:$0xff] %v528_v50  ;;  %v514_v55 = vadd.f32 %v1403_v28, %v491_v51  ;;  %v513_v56 = vadd.f32 %v1403_v28, %v490_v52  ;;  %v575_v57 = vpack.c.bf16 %v528_v50, %v527_v40 }
 0x197   :  { %v579_v58 = vpack.c.bf16 %v536_v49, %v535_v39  ;;  %v466_v59 = vpop.permute.xlu1 %465  ;;  %v461_v60 = vpop.permute.xlu0 %460 }
 0x198   :  { %v530_v61 = vmax.f32 %v514_v55, 0.0  ;;  %v529_v62 = vmax.f32 %v513_v56, 0.0  ;;  %v499_v63 = vmul.f32 %v466_v59, %v403_v53  ;;  %v498_v0 = vmul.f32 %v461_v60, %v402_v54  ;;  %1140 = vmatprep.mubr.bf16.mxu0 %v575_v57 }
 0x199   :  { %1148 = vmatprep.mubr.bf16.mxu1 %v579_v58 }
 0x19a   :  { %546 = vst [vmem:[#allocation2 + $0x18] sm:$0xff] %v530_v61  ;;  %545 = vst [vmem:[#allocation2 + $0x10] sm:$0xff] %v529_v62  ;;  %v522_v3 = vadd.f32 %v1403_v28, %v499_v63  ;;  %v521_v4 = vadd.f32 %v1403_v28, %v498_v0  ;;  %v576_v5 = vpack.c.bf16 %v530_v61, %v529_v62 }
 0x19b   :  { %v436_v6 = vpop.permute.xlu1 %435  ;;  %v431_v7 = vpop.permute.xlu0 %430 }
 0x19c   :  { %v538_v8 = vmax.f32 %v522_v3, 0.0  ;;  %v537_v9 = vmax.f32 %v521_v4, 0.0  ;;  %v493_v10 = vmul.f32 %v436_v6, %v397_v1  ;;  %v492_v11 = vmul.f32 %v431_v7, %v396_v2  ;;  %1141 = vmatmul.mubr.bf16.vlgmr.msra.gmra.mrb[0].mxu0 %v576_v5 }
 0x19e   :  { %554 = vst [vmem:[#allocation2 + $0x58] sm:$0xff] %v538_v8  ;;  %553 = vst [vmem:[#allocation2 + $0x50] sm:$0xff] %v537_v9  ;;  %v516_v14 = vadd.f32 %v1403_v28, %v493_v10  ;;  %v515_v15 = vadd.f32 %v1403_v28, %v492_v11  ;;  %v580_v16 = vpack.c.bf16 %v538_v8, %v537_v9 }
 0x19f   :  { %v476_v17 = vpop.permute.xlu1 %475  ;;  %v471_v18 = vpop.permute.xlu0 %470 }
 0x1a0   :  { %v532_v19 = vmax.f32 %v516_v14, 0.0  ;;  %v531_v20 = vmax.f32 %v515_v15, 0.0  ;;  %v501_v21 = vmul.f32 %v476_v17, %v405_v12  ;;  %v500_v22 = vmul.f32 %v471_v18, %v404_v13  ;;  %1149 = vmatmul.mubr.bf16.vlgmr.msra.gmra.mrb[0].mxu1 %v580_v16 }
 0x1a2   :  { %548 = vst [vmem:[#allocation2 + $0x28] sm:$0xff] %v532_v19  ;;  %547 = vst [vmem:[#allocation2 + $0x20] sm:$0xff] %v531_v20  ;;  %v524_v25 = vadd.f32 %v1403_v28, %v501_v21  ;;  %v523_v26 = vadd.f32 %v1403_v28, %v500_v22  ;;  %v577_v27 = vpack.c.bf16 %v532_v19, %v531_v20 }
 0x1a3   :  { %v446_v29 = vpop.permute.xlu1 %445  ;;  %v441_v30 = vpop.permute.xlu0 %440 }
 0x1a4   :  { %v540_v31 = vmax.f32 %v524_v25, 0.0  ;;  %v539_v32 = vmax.f32 %v523_v26, 0.0  ;;  %v495_v33 = vmul.f32 %v446_v29, %v399_v23  ;;  %v494_v34 = vmul.f32 %v441_v30, %v398_v24  ;;  %1144 = vmatprep.mubr.bf16.mxu0 %v577_v27 }
 0x1a6   :  { %556 = vst [vmem:[#allocation2 + $0x68] sm:$0xff] %v540_v31  ;;  %555 = vst [vmem:[#allocation2 + $0x60] sm:$0xff] %v539_v32  ;;  %v518_v37 = vadd.f32 %v1403_v28, %v495_v33  ;;  %v517_v38 = vadd.f32 %v1403_v28, %v494_v34  ;;  %v581_v39 = vpack.c.bf16 %v540_v31, %v539_v32 }
 0x1a7   :  { %v486_v40 = vpop.permute.xlu1 %485  ;;  %v481_v41 = vpop.permute.xlu0 %480 }
 0x1a8   :  { %v534_v42 = vmax.f32 %v518_v37, 0.0  ;;  %v533_v43 = vmax.f32 %v517_v38, 0.0  ;;  %v503_v44 = vmul.f32 %v486_v40, %v407_v35  ;;  %v502_v45 = vmul.f32 %v481_v41, %v406_v36  ;;  %1152 = vmatprep.mubr.bf16.mxu1 %v581_v39 }
 0x1aa   :  { %550 = vst [vmem:[#allocation2 + $0x38] sm:$0xff] %v534_v42  ;;  %549 = vst [vmem:[#allocation2 + $0x30] sm:$0xff] %v533_v43  ;;  %v526_v46 = vadd.f32 %v1403_v28, %v503_v44  ;;  %v525_v47 = vadd.f32 %v1403_v28, %v502_v45  ;;  %v578_v48 = vpack.c.bf16 %v534_v42, %v533_v43 }
 0x1ab   :  { %v768_v52 = vpop.permute.xlu1 %767  ;;  %v763_v53 = vpop.permute.xlu0 %762 }
 0x1ac   :  { %v542_v49 = vmax.f32 %v526_v46, 0.0  ;;  %v541_v50 = vmax.f32 %v525_v47, 0.0  ;;  %1145 = vmatmul.mubr.bf16.gmra.mrb[4].mxu0 %v578_v48 }
 0x1ae   :  { %558 = vst [vmem:[#allocation2 + $0x78] sm:$0xff] %v542_v49  ;;  %557 = vst [vmem:[#allocation2 + $0x70] sm:$0xff] %v541_v50  ;;  %v582_v51 = vpack.c.bf16 %v542_v49, %v541_v50 }
 0x1af   :  { %v778_v54 = vpop.permute.xlu1 %777  ;;  %v773_v55 = vpop.permute.xlu0 %772 }
 0x1b0   :  { %1153 = vmatmul.mubr.bf16.gmra.mrb[4].mxu1 %v582_v51 }
 0x1b3   :  { %v788_v56 = vpop.permute.xlu1 %787  ;;  %v783_v57 = vpop.permute.xlu0 %782 }
 0x1b7   :  { %v798_v58 = vpop.permute.xlu1 %797  ;;  %v793_v59 = vpop.permute.xlu0 %792 }
 0x1bb   :  { %v808_v60 = vpop.permute.xlu1 %807  ;;  %v803_v61 = vpop.permute.xlu0 %802 }
 0x1bf   :  { %v818_v6 = vpop.permute.xlu1 %817  ;;  %v813_v9 = vpop.permute.xlu0 %812 }
 0x1c3   :  { %v828_v19 = vpop.permute.xlu1 %827  ;;  %v823_v20 = vpop.permute.xlu0 %822 }
 0x1c7   :  { %v838_v31 = vpop.permute.xlu1 %837  ;;  %v833_v34 = vpop.permute.xlu0 %832 }
 0x26f   :  { %v1142_v62 = vpop.f32.mrb[0].mxu0 }
 0x270   :  { %v681_v28 = vpop.f32.mrb[1].mxu0  ;;  %v842_v0 = vmul.f32 %v1142_v62, %v773_v55 }
 0x271   :  { %v1143_v63 = vpop.f32.mrb[2].mxu0  ;;  %v840_v3 = vmul.f32 %v763_v53, %v681_v28 }
 0x272   :  { %v843_v1 = vmul.f32 %v1143_v63, %v778_v54  ;;  %v684_v2 = vpop.f32.mrb[3].mxu0 }
 0x273   :  { %v841_v4 = vmul.f32 %v768_v52, %v684_v2  ;;  %v1150_v5 = vpop.f32.mrb[0].mxu1 }
 0x274   :  { %v1021_v7 = vpack.c.bf16 %v843_v1, %v842_v0  ;;  %v713_v8 = vpop.f32.mrb[1].mxu1  ;;  %v850_v12 = vmul.f32 %v1150_v5, %v813_v9 }
 0x275   :  { %v1016_v10 = vpack.c.bf16 %v841_v4, %v840_v3  ;;  %v1151_v11 = vpop.f32.mrb[2].mxu1  ;;  %v848_v15 = vmul.f32 %v803_v61, %v713_v8 }
 0x276   :  { %1053 = vst [vmem:[%s1450_s7 + $0x8] sm:$0xff] %v1021_v7   ;;  %v851_v13 = vmul.f32 %v1151_v11, %v818_v6  ;;  %v716_v14 = vpop.f32.mrb[3].mxu1 }
 0x277   :  { %1017 = vst [vmem:[%s1450_s7] sm:$0xff] %v1016_v10   ;;  %v849_v16 = vmul.f32 %v808_v60, %v716_v14 }
 0x278   :  { %v1041_v17 = vpack.c.bf16 %v851_v13, %v850_v12 }
 0x279   :  { %v1036_v18 = vpack.c.bf16 %v849_v16, %v848_v15 }
 0x27a   :  { %1057 = vst [vmem:[%s1450_s7 + $0x28] sm:$0xff] %v1041_v17  }
 0x27b   :  { %1056 = vst [vmem:[%s1450_s7 + $0x20] sm:$0xff] %v1036_v18  }
 0x27f   :  { %v1146_v21 = vpop.f32.mrb[4].mxu0 }
 0x280   :  { %v697_v22 = vpop.f32.mrb[5].mxu0  ;;  %v846_v24 = vmul.f32 %v1146_v21, %v793_v59 }
 0x281   :  { %v1147_v23 = vpop.f32.mrb[6].mxu0  ;;  %v844_v27 = vmul.f32 %v783_v57, %v697_v22 }
 0x282   :  { %v847_v25 = vmul.f32 %v1147_v23, %v798_v58  ;;  %v700_v26 = vpop.f32.mrb[7].mxu0 }
 0x283   :  { %v845_v29 = vmul.f32 %v788_v56, %v700_v26  ;;  %v1154_v30 = vpop.f32.mrb[4].mxu1 }
 0x284   :  { %v1031_v32 = vpack.c.bf16 %v847_v25, %v846_v24  ;;  %v729_v33 = vpop.f32.mrb[5].mxu1  ;;  %v854_v37 = vmul.f32 %v1154_v30, %v833_v34 }
 0x285   :  { %v1026_v35 = vpack.c.bf16 %v845_v29, %v844_v27  ;;  %v1155_v36 = vpop.f32.mrb[6].mxu1  ;;  %v852_v40 = vmul.f32 %v823_v20, %v729_v33 }
 0x286   :  { %1055 = vst [vmem:[%s1450_s7 + $0x18] sm:$0xff] %v1031_v32   ;;  %v855_v38 = vmul.f32 %v1155_v36, %v838_v31  ;;  %v732_v39 = vpop.f32.mrb[7].mxu1 }
 0x287   :  { %1054 = vst [vmem:[%s1450_s7 + $0x10] sm:$0xff] %v1026_v35   ;;  %v853_v41 = vmul.f32 %v828_v19, %v732_v39 }
 0x288   :  { %v1051_v42 = vpack.c.bf16 %v855_v38, %v854_v37 }
 0x289   :  { %v1046_v43 = vpack.c.bf16 %v853_v41, %v852_v40 }
 0x28a   :  { %1059 = vst [vmem:[%s1450_s7 + $0x38] sm:$0xff] %v1051_v42  }
 0x28b   :  { %1058 = vst [vmem:[%s1450_s7 + $0x30] sm:$0xff] %v1046_v43  }

// kernel: gcn_forward.3
= control target key start
LH: loop header
LB: loop body
LE: loop exit
PB: predicated region body
PF: predicated region fallthrough
CT: control target
= control target key end

     0   :  { %v614_v1 = vmov 0   ;;  %s755_s2 = inlined_call_operand.vmem [shape: bf16[128,128], index: 2, kind: input, shape index: {}]   ;;  %s756_s0 = inlined_call_operand.vmem [shape: bf16[128,128], index: 0, kind: input, shape index: {}]   ;;  %s757_s1 = inlined_call_operand.vmem [shape: f32[128,1], index: 1, kind: input, shape index: {}]   ;;  %s758_s3 = inlined_call_operand.vmem [shape: bf16[128,128], index: 3, kind: output, shape index: {}]  }
   0x1   :  { %v598_v0 = vld [vmem:[%s755_s2] sm:$0xff]   ;;  %597 = vset.pattern.permute.xlu1 %v614_v1  ;;  %596 = vset.pattern.permute.xlu0 %v614_v1  ;;  %v599_v2 = vld [vmem:[%s755_s2 + $0x8] sm:$0xff]   ;;  %v600_v3 = vld [vmem:[%s755_s2 + $0x10] sm:$0xff]  }
   0x2   :  { %547 = vmatprep.subr.bf16.mxu0 %v598_v0  ;;  %579 = vmatprep.subr.bf16.mxu1 %v598_v0  ;;  %v601_v4 = vld [vmem:[%s755_s2 + $0x18] sm:$0xff]   ;;  %v606_v5 = vld [vmem:[%s756_s0] sm:$0xff]   ;;  %v603_v8 = vld [vmem:[%s755_s2 + $0x28] sm:$0xff]  }
   0x3   :  { %548 = vmatpush3.bf16.msra.mxu0 %v598_v0  ;;  %587 = vmatpush3.bf16.msra.mxu1 %v598_v0  ;;  %v607_v6 = vld [vmem:[%s756_s0 + $0x20] sm:$0xff]   ;;  %v242_v9 = vld [vmem:[%s757_s1 + $0x10] sm:$0xff]  ;;  %v243_v11 = vld [vmem:[%s757_s1 + $0x18] sm:$0xff] }
   0x4   :  { %549 = vmatprep.subr.bf16.mxu0 %v599_v2  ;;  %580 = vmatprep.subr.bf16.mxu1 %v599_v2  ;;  %v602_v7 = vld [vmem:[%s755_s2 + $0x20] sm:$0xff]   ;;  %v241_v12 = vld [vmem:[%s757_s1 + $0x8] sm:$0xff]  ;;  %v604_v13 = vld [vmem:[%s755_s2 + $0x30] sm:$0xff]  }
   0x5   :  { %563 = vmatprep.mubr.bf16.mxu0 %v606_v5  ;;  %571 = vmatprep.mubr.bf16.mxu1 %v607_v6  ;;  %v240_v10 = vld [vmem:[%s757_s1] sm:$0xff]  ;;  %v245_v14 = vld [vmem:[%s757_s1 + $0x28] sm:$0xff]  ;;  %v605_v16 = vld [vmem:[%s755_s2 + $0x38] sm:$0xff]  }
   0x6   :  { %268 = vperm.xlu1 %597, %v242_v9   ;;  %258 = vperm.xlu0 %596, %v240_v10   ;;  %v244_v15 = vld [vmem:[%s757_s1 + $0x20] sm:$0xff]  ;;  %v247_v17 = vld [vmem:[%s757_s1 + $0x38] sm:$0xff]  ;;  %v246_v18 = vld [vmem:[%s757_s1 + $0x30] sm:$0xff] }
   0x7   :  { %550 = vmatpush3.bf16.msra.mxu0 %v599_v2  ;;  %588 = vmatpush3.bf16.msra.mxu1 %v599_v2  ;;  %v608_v19 = vld [vmem:[%s756_s0 + $0x8] sm:$0xff]   ;;  %v248_v22 = vld [vmem:[%s757_s1 + $0x40] sm:$0xff]  ;;  %v610_v23 = vld [vmem:[%s756_s0 + $0x10] sm:$0xff]  }
   0x8   :  { %551 = vmatprep.subr.bf16.mxu0 %v600_v3  ;;  %581 = vmatprep.subr.bf16.mxu1 %v600_v3  ;;  %v609_v20 = vld [vmem:[%s756_s0 + $0x28] sm:$0xff]   ;;  %v611_v24 = vld [vmem:[%s756_s0 + $0x30] sm:$0xff]   ;;  %v251_v25 = vld [vmem:[%s757_s1 + $0x58] sm:$0xff] }
   0x9   :  { %v249_v21 = vld [vmem:[%s757_s1 + $0x48] sm:$0xff]  ;;  %v250_v26 = vld [vmem:[%s757_s1 + $0x50] sm:$0xff]  ;;  %v612_v27 = vld [vmem:[%s756_s0 + $0x18] sm:$0xff]  }
   0xa   :  { %273 = vperm.xlu1 %597, %v243_v11   ;;  %263 = vperm.xlu0 %596, %v241_v12   ;;  %v613_v28 = vld [vmem:[%s756_s0 + $0x38] sm:$0xff]   ;;  %v253_v29 = vld [vmem:[%s757_s1 + $0x68] sm:$0xff]  ;;  %v252_v30 = vld [vmem:[%s757_s1 + $0x60] sm:$0xff] }
   0xb   :  { %552 = vmatpush3.bf16.msra.mxu0 %v600_v3  ;;  %589 = vmatpush3.bf16.msra.mxu1 %v600_v3  ;;  %v255_v31 = vld [vmem:[%s757_s1 + $0x78] sm:$0xff]  ;;  %v254_v32 = vld [vmem:[%s757_s1 + $0x70] sm:$0xff] }
   0xc   :  { %553 = vmatprep.subr.bf16.mxu0 %v601_v4  ;;  %582 = vmatprep.subr.bf16.mxu1 %v601_v4 }
   0xe   :  { %283 = vperm.xlu1 %597, %v245_v14   ;;  %278 = vperm.xlu0 %596, %v244_v15  }
   0xf   :  { %554 = vmatpush3.bf16.msra.mxu0 %v601_v4  ;;  %590 = vmatpush3.bf16.msra.mxu1 %v601_v4 }
  0x10   :  { %555 = vmatprep.subr.bf16.mxu0 %v602_v7  ;;  %583 = vmatprep.subr.bf16.mxu1 %v602_v7 }
  0x12   :  { %293 = vperm.xlu1 %597, %v247_v17   ;;  %288 = vperm.xlu0 %596, %v246_v18  }
  0x13   :  { %556 = vmatpush3.bf16.msra.mxu0 %v602_v7  ;;  %591 = vmatpush3.bf16.msra.mxu1 %v602_v7 }
  0x14   :  { %557 = vmatprep.subr.bf16.mxu0 %v603_v8  ;;  %584 = vmatprep.subr.bf16.mxu1 %v603_v8 }
  0x16   :  { %303 = vperm.xlu1 %597, %v249_v21   ;;  %298 = vperm.xlu0 %596, %v248_v22  }
  0x17   :  { %558 = vmatpush3.bf16.msra.mxu0 %v603_v8  ;;  %592 = vmatpush3.bf16.msra.mxu1 %v603_v8 }
  0x18   :  { %559 = vmatprep.subr.bf16.mxu0 %v604_v13  ;;  %585 = vmatprep.subr.bf16.mxu1 %v604_v13 }
  0x1a   :  { %313 = vperm.xlu1 %597, %v251_v25   ;;  %308 = vperm.xlu0 %596, %v250_v26  }
  0x1b   :  { %560 = vmatpush3.bf16.msra.mxu0 %v604_v13  ;;  %593 = vmatpush3.bf16.msra.mxu1 %v604_v13 }
  0x1c   :  { %561 = vmatprep.subr.bf16.mxu0 %v605_v16  ;;  %586 = vmatprep.subr.bf16.mxu1 %v605_v16 }
  0x1e   :  { %323 = vperm.xlu1 %597, %v253_v29   ;;  %318 = vperm.xlu0 %596, %v252_v30  }
  0x1f   :  { %562 = vmatpush3.bf16.msra.mxu0 %v605_v16  ;;  %594 = vmatpush3.bf16.msra.mxu1 %v605_v16 }
  0x22   :  { %564 = vmatmul.mubr.bf16.vlgmr.msra.gmra.mrb[0].mxu0 %v608_v19  ;;  %572 = vmatmul.mubr.bf16.vlgmr.msra.gmra.mrb[0].mxu1 %v609_v20 }
  0x23   :  { %567 = vmatprep.mubr.bf16.mxu0 %v610_v23  ;;  %575 = vmatprep.mubr.bf16.mxu1 %v611_v24 }
  0x24   :  { %333 = vperm.xlu1 %597, %v255_v31   ;;  %328 = vperm.xlu0 %596, %v254_v32  }
  0x2a   :  { %568 = vmatmul.mubr.bf16.gmra.mrb[4].mxu0 %v612_v27  ;;  %576 = vmatmul.mubr.bf16.gmra.mrb[4].mxu1 %v613_v28 }
  0x85   :  { %v269_v33 = vpop.permute.xlu1 %268  ;;  %v259_v34 = vpop.permute.xlu0 %258 }
  0x89   :  { %v274_v35 = vpop.permute.xlu1 %273  ;;  %v264_v36 = vpop.permute.xlu0 %263 }
  0x8d   :  { %v284_v37 = vpop.permute.xlu1 %283  ;;  %v279_v38 = vpop.permute.xlu0 %278 }
  0x91   :  { %v294_v39 = vpop.permute.xlu1 %293  ;;  %v289_v40 = vpop.permute.xlu0 %288 }
  0x95   :  { %v304_v41 = vpop.permute.xlu1 %303  ;;  %v299_v42 = vpop.permute.xlu0 %298 }
  0x99   :  { %v314_v43 = vpop.permute.xlu1 %313  ;;  %v309_v44 = vpop.permute.xlu0 %308 }
  0x9d   :  { %v324_v45 = vpop.permute.xlu1 %323  ;;  %v319_v46 = vpop.permute.xlu0 %318 }
  0xa3   :  { %v334_v3 = vpop.permute.xlu1 %333  ;;  %v329_v4 = vpop.permute.xlu0 %328 }
  0xf5   :  { %v565_v47 = vpop.f32.mrb[0].mxu0  ;;  %v573_v48 = vpop.f32.mrb[0].mxu1 }
  0xf6   :  { %v177_v49 = vpop.f32.mrb[1].mxu0  ;;  %v209_v50 = vpop.f32.mrb[1].mxu1  ;;  %v338_v53 = vmul.f32 %v565_v47, %v269_v33  ;;  %v346_v54 = vmul.f32 %v573_v48, %v309_v44 }
  0xf7   :  { %v566_v51 = vpop.f32.mrb[2].mxu0  ;;  %v574_v52 = vpop.f32.mrb[2].mxu1  ;;  %v336_v59 = vmul.f32 %v259_v34, %v177_v49  ;;  %v344_v60 = vmul.f32 %v299_v42, %v209_v50 }
  0xf8   :  { %v339_v55 = vmul.f32 %v566_v51, %v274_v35  ;;  %v347_v56 = vmul.f32 %v574_v52, %v314_v43  ;;  %v180_v57 = vpop.f32.mrb[3].mxu0  ;;  %v212_v58 = vpop.f32.mrb[3].mxu1 }
  0xf9   :  { %v337_v61 = vmul.f32 %v264_v36, %v180_v57  ;;  %v345_v62 = vmul.f32 %v304_v41, %v212_v58 }
  0xfa   :  { %v492_v63 = vpack.c.bf16 %v339_v55, %v338_v53  ;;  %v512_v0 = vpack.c.bf16 %v347_v56, %v346_v54 }
  0xfb   :  { %v487_v1 = vpack.c.bf16 %v337_v61, %v336_v59  ;;  %v507_v2 = vpack.c.bf16 %v345_v62, %v344_v60 }
  0xfc   :  { %524 = vst [vmem:[%s758_s3 + $0x8] sm:$0xff] %v492_v63   ;;  %528 = vst [vmem:[%s758_s3 + $0x28] sm:$0xff] %v512_v0  }
  0xfd   :  { %488 = vst [vmem:[%s758_s3] sm:$0xff] %v487_v1   ;;  %527 = vst [vmem:[%s758_s3 + $0x20] sm:$0xff] %v507_v2   ;;  %v569_v5 = vpop.f32.mrb[4].mxu0  ;;  %v577_v6 = vpop.f32.mrb[4].mxu1 }
  0xfe   :  { %v193_v7 = vpop.f32.mrb[5].mxu0  ;;  %v225_v8 = vpop.f32.mrb[5].mxu1  ;;  %v342_v11 = vmul.f32 %v569_v5, %v289_v40  ;;  %v350_v12 = vmul.f32 %v577_v6, %v329_v4 }
  0xff   :  { %v570_v9 = vpop.f32.mrb[6].mxu0  ;;  %v578_v10 = vpop.f32.mrb[6].mxu1  ;;  %v340_v17 = vmul.f32 %v279_v38, %v193_v7  ;;  %v348_v18 = vmul.f32 %v319_v46, %v225_v8 }
 0x100   :  { %v343_v13 = vmul.f32 %v570_v9, %v294_v39  ;;  %v351_v14 = vmul.f32 %v578_v10, %v334_v3  ;;  %v196_v15 = vpop.f32.mrb[7].mxu0  ;;  %v228_v16 = vpop.f32.mrb[7].mxu1 }
 0x101   :  { %v341_v19 = vmul.f32 %v284_v37, %v196_v15  ;;  %v349_v20 = vmul.f32 %v324_v45, %v228_v16 }
 0x102   :  { %v502_v21 = vpack.c.bf16 %v343_v13, %v342_v11  ;;  %v522_v22 = vpack.c.bf16 %v351_v14, %v350_v12 }
 0x103   :  { %v497_v23 = vpack.c.bf16 %v341_v19, %v340_v17  ;;  %v517_v24 = vpack.c.bf16 %v349_v20, %v348_v18 }
 0x104   :  { %526 = vst [vmem:[%s758_s3 + $0x18] sm:$0xff] %v502_v21   ;;  %530 = vst [vmem:[%s758_s3 + $0x38] sm:$0xff] %v522_v22  }
 0x105   :  { %525 = vst [vmem:[%s758_s3 + $0x10] sm:$0xff] %v497_v23   ;;  %529 = vst [vmem:[%s758_s3 + $0x30] sm:$0xff] %v517_v24  }

// kernel: gcn_forward.5
= control target key start
LH: loop header
LB: loop body
LE: loop exit
PB: predicated region body
PF: predicated region fallthrough
CT: control target
= control target key end

     0   :  { %v661_v0 = vmov 0.0   ;;  %s1049_s0 = inlined_call_operand.<no memory space> [shape: s32[1], index: 0, kind: input, shape index: {}]   ;;  %s1050_s1 = inlined_call_operand.<no memory space> [shape: s32[1], index: 1, kind: input, shape index: {}]   ;;  %s1051_s4 = inlined_call_operand.vmem [shape: f32[128,1], index: 4, kind: input, shape index: {}]   ;;  %s1052_s5 = inlined_call_operand.vmem [shape: f32[1,128], index: 5, kind: input, shape index: {}]   ;;  %s1053_s6 = inlined_call_operand.vmem [shape: f32[128,128], index: 6, kind: output, shape index: {}]   ;;  %s1054_s2 = inlined_call_operand.vmem [shape: bf16[128,128], index: 2, kind: input, shape index: {}]   ;;  %s1055_s3 = inlined_call_operand.vmem [shape: bf16[128,128], index: 3, kind: input, shape index: {}]  }
   0x1   :  { %p54_p0 = scmp.lt.s32.totalorder %s1050_s1, 0  ;;  %s557_s25 = sshll.u32 %s1050_s1, 4  ;;  %75 = vst [vmem:[%s1053_s6] sm:$0xff] %v661_v0  ;;  %76 = vst [vmem:[%s1053_s6 + $0x8] sm:$0xff] %v661_v0 }
   0x2   :  { %77 = vst [vmem:[%s1053_s6 + $0x10] sm:$0xff] %v661_v0  ;;  %78 = vst [vmem:[%s1053_s6 + $0x18] sm:$0xff] %v661_v0  ;;  %p63_p1 = scmp.lt.s32.totalorder %s557_s25, 15  ;;  %p559_p2 = scmp.le.s32.totalorder %s1049_s0, 0 }
   0x3   :  { %79 = vst [vmem:[%s1053_s6 + $0x20] sm:$0xff] %v661_v0  ;;  %80 = vst [vmem:[%s1053_s6 + $0x28] sm:$0xff] %v661_v0  ;;  %s1057_s1 = smov (!%p54_p0, %s1050_s1), 0 }
   0x4   :  { %81 = vst [vmem:[%s1053_s6 + $0x30] sm:$0xff] %v661_v0  ;;  %82 = vst [vmem:[%s1053_s6 + $0x38] sm:$0xff] %v661_v0  ;;  %s1059_s25 = smov (!%p63_p1, %s557_s25), 15  ;;  %s556_s15 = sshll.u32 %s1057_s1, 2 }
   0x5   :  { %83 = vst [vmem:[%s1053_s6 + $0x40] sm:$0xff] %v661_v0  ;;  %84 = vst [vmem:[%s1053_s6 + $0x48] sm:$0xff] %v661_v0  ;;  %s762_s18 = scalar_lea.vmem %s1054_s2, %s556_s15  ;;  %s558_s19 = sshll.u32 %s1059_s25, 2 }
   0x6   :  { %85 = vst [vmem:[%s1053_s6 + $0x50] sm:$0xff] %v661_v0  ;;  %86 = vst [vmem:[%s1053_s6 + $0x58] sm:$0xff] %v661_v0  ;;  %s767_s22 = scalar_lea.vmem %s1055_s3, %s558_s19  ;;  %96 = sbr.rel (%p559_p2) target bundleno = 266 (0x10a), region = 25  ;;  %v651_v5 = vld [vmem:[%s762_s18] sm:$0xff] (!%p559_p2)   ;;  %v653_v11 = vld [vmem:[%s762_s18 + $0x8] sm:$0xff] (!%p559_p2)  }
   0x7   :  { %87 = vst [vmem:[%s1053_s6 + $0x60] sm:$0xff] %v661_v0  ;;  %88 = vst [vmem:[%s1053_s6 + $0x68] sm:$0xff] %v661_v0  ;;  %v643_v1 = vld [vmem:[%s767_s22] sm:$0xff] (!%p559_p2)   ;;  %v644_v2 = vld [vmem:[%s767_s22 + $0x8] sm:$0xff] (!%p559_p2)   ;;  %609 = vmatprep.mubr.bf16.mxu0 (!%p559_p2), %v651_v5 }
   0x8   :  { %89 = vst [vmem:[%s1053_s6 + $0x70] sm:$0xff] %v661_v0  ;;  %90 = vst [vmem:[%s1053_s6 + $0x78] sm:$0xff] %v661_v0  ;;  %593 = vmatprep.subr.bf16.mxu0 (!%p559_p2), %v643_v1  ;;  %625 = vmatprep.subr.bf16.mxu1 (!%p559_p2), %v643_v1  ;;  %v645_v3 = vld [vmem:[%s767_s22 + $0x10] sm:$0xff] (!%p559_p2)   ;;  %v646_v4 = vld [vmem:[%s767_s22 + $0x18] sm:$0xff] (!%p559_p2)  }
   0x9   :  { %594 = vmatpush3.bf16.msra.mxu0 (!%p559_p2), %v643_v1  ;;  %633 = vmatpush3.bf16.msra.mxu1 (!%p559_p2), %v643_v1  ;;  %v652_v6 = vld [vmem:[%s762_s18 + $0x20] sm:$0xff] (!%p559_p2)   ;;  %v648_v8 = vld [vmem:[%s767_s22 + $0x28] sm:$0xff] (!%p559_p2)   ;;  %v649_v9 = vld [vmem:[%s767_s22 + $0x30] sm:$0xff] (!%p559_p2)  }
   0xa   :  { %595 = vmatprep.subr.bf16.mxu0 (!%p559_p2), %v644_v2  ;;  %626 = vmatprep.subr.bf16.mxu1 (!%p559_p2), %v644_v2  ;;  %v647_v7 = vld [vmem:[%s767_s22 + $0x20] sm:$0xff] (!%p559_p2)   ;;  %v650_v10 = vld [vmem:[%s767_s22 + $0x38] sm:$0xff] (!%p559_p2)   ;;  %v654_v12 = vld [vmem:[%s762_s18 + $0x28] sm:$0xff] (!%p559_p2)  }
   0xb   :  { %617 = vmatprep.mubr.bf16.mxu1 (!%p559_p2), %v652_v6  ;;  %v655_v13 = vld [vmem:[%s762_s18 + $0x10] sm:$0xff] (!%p559_p2)   ;;  %v657_v15 = vld [vmem:[%s762_s18 + $0x18] sm:$0xff] (!%p559_p2)   ;;  %v97_v19 = vld [vmem:[%s1053_s6] sm:$0xff] (!%p559_p2) }
   0xc   :  { %v656_v14 = vld [vmem:[%s762_s18 + $0x30] sm:$0xff] (!%p559_p2)   ;;  %v658_v16 = vld [vmem:[%s762_s18 + $0x38] sm:$0xff] (!%p559_p2)   ;;  %v105_v20 = vld [vmem:[%s1053_s6 + $0x40] sm:$0xff] (!%p559_p2) }
   0xd   :  { %596 = vmatpush3.bf16.msra.mxu0 %v644_v2  ;;  %634 = vmatpush3.bf16.msra.mxu1 %v644_v2  ;;  %v99_v17 = vld [vmem:[%s1053_s6 + $0x10] sm:$0xff]  ;;  %v100_v23 = vld [vmem:[%s1053_s6 + $0x18] sm:$0xff]  ;;  %v98_v29 = vld [vmem:[%s1053_s6 + $0x8] sm:$0xff] }
   0xe   :  { %597 = vmatprep.subr.bf16.mxu0 %v645_v3  ;;  %627 = vmatprep.subr.bf16.mxu1 %v645_v3  ;;  %v107_v18 = vld [vmem:[%s1053_s6 + $0x50] sm:$0xff]  ;;  %v108_v24 = vld [vmem:[%s1053_s6 + $0x58] sm:$0xff]  ;;  %v106_v30 = vld [vmem:[%s1053_s6 + $0x48] sm:$0xff] }
   0xf   :  { %v103_v41 = vld [vmem:[%s1053_s6 + $0x30] sm:$0xff]  ;;  %v101_v43 = vld [vmem:[%s1053_s6 + $0x20] sm:$0xff]  ;;  %v104_v47 = vld [vmem:[%s1053_s6 + $0x38] sm:$0xff] }
  0x10   :  { %v111_v42 = vld [vmem:[%s1053_s6 + $0x70] sm:$0xff]  ;;  %v109_v44 = vld [vmem:[%s1053_s6 + $0x60] sm:$0xff]  ;;  %v112_v48 = vld [vmem:[%s1053_s6 + $0x78] sm:$0xff] }
  0x11   :  { %598 = vmatpush3.bf16.msra.mxu0 %v645_v3  ;;  %635 = vmatpush3.bf16.msra.mxu1 %v645_v3  ;;  %v102_v53 = vld [vmem:[%s1053_s6 + $0x28] sm:$0xff] }
  0x12   :  { %599 = vmatprep.subr.bf16.mxu0 %v646_v4  ;;  %628 = vmatprep.subr.bf16.mxu1 %v646_v4  ;;  %v110_v54 = vld [vmem:[%s1053_s6 + $0x68] sm:$0xff] }
  0x15   :  { %600 = vmatpush3.bf16.msra.mxu0 %v646_v4  ;;  %636 = vmatpush3.bf16.msra.mxu1 %v646_v4 }
  0x16   :  { %601 = vmatprep.subr.bf16.mxu0 %v647_v7  ;;  %629 = vmatprep.subr.bf16.mxu1 %v647_v7 }
  0x19   :  { %602 = vmatpush3.bf16.msra.mxu0 %v647_v7  ;;  %637 = vmatpush3.bf16.msra.mxu1 %v647_v7 }
  0x1a   :  { %603 = vmatprep.subr.bf16.mxu0 %v648_v8  ;;  %630 = vmatprep.subr.bf16.mxu1 %v648_v8 }
  0x1d   :  { %604 = vmatpush3.bf16.msra.mxu0 %v648_v8  ;;  %638 = vmatpush3.bf16.msra.mxu1 %v648_v8 }
  0x1e   :  { %605 = vmatprep.subr.bf16.mxu0 %v649_v9  ;;  %631 = vmatprep.subr.bf16.mxu1 %v649_v9 }
  0x21   :  { %606 = vmatpush3.bf16.msra.mxu0 %v649_v9  ;;  %639 = vmatpush3.bf16.msra.mxu1 %v649_v9 }
  0x22   :  { %607 = vmatprep.subr.bf16.mxu0 %v650_v10  ;;  %632 = vmatprep.subr.bf16.mxu1 %v650_v10 }
  0x25   :  { %608 = vmatpush3.bf16.msra.mxu0 %v650_v10  ;;  %640 = vmatpush3.bf16.msra.mxu1 %v650_v10 }
  0x28   :  { %610 = vmatmul.mubr.bf16.vlgmr.msra.gmra.mrb[0].mxu0 %v653_v11  ;;  %618 = vmatmul.mubr.bf16.vlgmr.msra.gmra.mrb[0].mxu1 %v654_v12 }
  0x29   :  { %613 = vmatprep.mubr.bf16.mxu0 %v655_v13  ;;  %621 = vmatprep.mubr.bf16.mxu1 %v656_v14 }
  0x30   :  { %614 = vmatmul.mubr.bf16.gmra.mrb[4].mxu0 %v657_v15  ;;  %622 = vmatmul.mubr.bf16.gmra.mrb[4].mxu1 %v658_v16 }
  0xfb   :  { %v611_v21 = vpop.f32.mrb[0].mxu0  ;;  %v619_v22 = vpop.f32.mrb[0].mxu1 }
  0xfc   :  { %v340_v25 = vadd.f32 %v611_v21, %v99_v17  ;;  %v348_v26 = vadd.f32 %v619_v22, %v107_v18  ;;  %v275_v27 = vpop.f32.mrb[1].mxu0  ;;  %v307_v28 = vpop.f32.mrb[1].mxu1 }
  0xfd   :  { %v338_v31 = vadd.f32 %v275_v27, %v97_v19  ;;  %v346_v32 = vadd.f32 %v307_v28, %v105_v20  ;;  %v612_v33 = vpop.f32.mrb[2].mxu0  ;;  %v620_v34 = vpop.f32.mrb[2].mxu1 }
  0xfe   :  { %356 = vst [vmem:[%s1053_s6 + $0x10] sm:$0xff] %v340_v25  ;;  %364 = vst [vmem:[%s1053_s6 + $0x50] sm:$0xff] %v348_v26  ;;  %v341_v35 = vadd.f32 %v612_v33, %v100_v23  ;;  %v349_v36 = vadd.f32 %v620_v34, %v108_v24  ;;  %v278_v37 = vpop.f32.mrb[3].mxu0  ;;  %v310_v38 = vpop.f32.mrb[3].mxu1 }
  0xff   :  { %354 = vst [vmem:[%s1053_s6] sm:$0xff] %v338_v31  ;;  %362 = vst [vmem:[%s1053_s6 + $0x40] sm:$0xff] %v346_v32  ;;  %v339_v39 = vadd.f32 %v278_v37, %v98_v29  ;;  %v347_v40 = vadd.f32 %v310_v38, %v106_v30 }
 0x100   :  { %357 = vst [vmem:[%s1053_s6 + $0x18] sm:$0xff] %v341_v35  ;;  %365 = vst [vmem:[%s1053_s6 + $0x58] sm:$0xff] %v349_v36 }
 0x101   :  { %355 = vst [vmem:[%s1053_s6 + $0x8] sm:$0xff] %v339_v39  ;;  %363 = vst [vmem:[%s1053_s6 + $0x48] sm:$0xff] %v347_v40 }
 0x103   :  { %v615_v45 = vpop.f32.mrb[4].mxu0  ;;  %v623_v46 = vpop.f32.mrb[4].mxu1 }
 0x104   :  { %v344_v49 = vadd.f32 %v615_v45, %v103_v41  ;;  %v352_v50 = vadd.f32 %v623_v46, %v111_v42  ;;  %v291_v51 = vpop.f32.mrb[5].mxu0  ;;  %v323_v52 = vpop.f32.mrb[5].mxu1 }
 0x105   :  { %v342_v55 = vadd.f32 %v291_v51, %v101_v43  ;;  %v350_v56 = vadd.f32 %v323_v52, %v109_v44  ;;  %v616_v57 = vpop.f32.mrb[6].mxu0  ;;  %v624_v58 = vpop.f32.mrb[6].mxu1 }
 0x106   :  { %360 = vst [vmem:[%s1053_s6 + $0x30] sm:$0xff] %v344_v49  ;;  %368 = vst [vmem:[%s1053_s6 + $0x70] sm:$0xff] %v352_v50  ;;  %v345_v59 = vadd.f32 %v616_v57, %v104_v47  ;;  %v353_v60 = vadd.f32 %v624_v58, %v112_v48  ;;  %v294_v61 = vpop.f32.mrb[7].mxu0  ;;  %v326_v62 = vpop.f32.mrb[7].mxu1 }
 0x107   :  { %358 = vst [vmem:[%s1053_s6 + $0x20] sm:$0xff] %v342_v55  ;;  %366 = vst [vmem:[%s1053_s6 + $0x60] sm:$0xff] %v350_v56  ;;  %v343_v63 = vadd.f32 %v294_v61, %v102_v53  ;;  %v351_v0 = vadd.f32 %v326_v62, %v110_v54 }
 0x108   :  { %361 = vst [vmem:[%s1053_s6 + $0x38] sm:$0xff] %v345_v59  ;;  %369 = vst [vmem:[%s1053_s6 + $0x78] sm:$0xff] %v353_v60 }
 0x109   :  { %359 = vst [vmem:[%s1053_s6 + $0x28] sm:$0xff] %v343_v63  ;;  %367 = vst [vmem:[%s1053_s6 + $0x68] sm:$0xff] %v351_v0 }
 0x10a PF:  { %v375_v1 = vld [vmem:[%s1051_s4 + $0x10] sm:$0xff]  ;;  %v373_v2 = vld [vmem:[%s1051_s4] sm:$0xff]  ;;  %v662_v3 = vmov 0   ;;  %v376_v4 = vld [vmem:[%s1051_s4 + $0x18] sm:$0xff] }
 0x10b   :  { %660 = vset.pattern.permute.xlu1 %v662_v3  ;;  %659 = vset.pattern.permute.xlu0 %v662_v3  ;;  %v374_v5 = vld [vmem:[%s1051_s4 + $0x8] sm:$0xff]  ;;  %v377_v7 = vld [vmem:[%s1051_s4 + $0x20] sm:$0xff]  ;;  %v380_v8 = vld [vmem:[%s1051_s4 + $0x38] sm:$0xff] }
 0x10c   :  { %417 = vperm.xlu1 %660, %v375_v1   ;;  %407 = vperm.xlu0 %659, %v373_v2   ;;  %v378_v6 = vld [vmem:[%s1051_s4 + $0x28] sm:$0xff]  ;;  %v379_v9 = vld [vmem:[%s1051_s4 + $0x30] sm:$0xff]  ;;  %v381_v11 = vld [vmem:[%s1051_s4 + $0x40] sm:$0xff] }
 0x10d   :  { %v382_v10 = vld [vmem:[%s1051_s4 + $0x48] sm:$0xff]  ;;  %v384_v12 = vld [vmem:[%s1051_s4 + $0x58] sm:$0xff]  ;;  %v383_v13 = vld [vmem:[%s1051_s4 + $0x50] sm:$0xff] }
 0x10e   :  { %v386_v14 = vld [vmem:[%s1051_s4 + $0x68] sm:$0xff]  ;;  %v385_v15 = vld [vmem:[%s1051_s4 + $0x60] sm:$0xff]  ;;  %v388_v16 = vld [vmem:[%s1051_s4 + $0x78] sm:$0xff] }
 0x10f   :  { %v387_v17 = vld [vmem:[%s1051_s4 + $0x70] sm:$0xff]  ;;  %v389_v19 = vld [vmem:[%s1053_s6] sm:$0xff]  ;;  %v392_v25 = vld [vmem:[%s1053_s6 + $0x18] sm:$0xff] }
 0x110   :  { %422 = vperm.xlu1 %660, %v376_v4   ;;  %412 = vperm.xlu0 %659, %v374_v5   ;;  %v391_v18 = vld [vmem:[%s1053_s6 + $0x10] sm:$0xff]  ;;  %v941_v20 = vld [vmem:[%s1052_s5] ss:$0 sm:$0xff]  ;;  %v390_v26 = vld [vmem:[%s1053_s6 + $0x8] sm:$0xff] }
 0x111   :  { %v394_v33 = vld [vmem:[%s1053_s6 + $0x28] sm:$0xff]  ;;  %v393_v34 = vld [vmem:[%s1053_s6 + $0x20] sm:$0xff]  ;;  %v396_v41 = vld [vmem:[%s1053_s6 + $0x38] sm:$0xff] }
 0x112   :  { %v395_v42 = vld [vmem:[%s1053_s6 + $0x30] sm:$0xff]  ;;  %v398_v49 = vld [vmem:[%s1053_s6 + $0x48] sm:$0xff]  ;;  %v397_v50 = vld [vmem:[%s1053_s6 + $0x40] sm:$0xff] }
 0x113   :  { %v400_v57 = vld [vmem:[%s1053_s6 + $0x58] sm:$0xff]  ;;  %v399_v58 = vld [vmem:[%s1053_s6 + $0x50] sm:$0xff]  ;;  %v402_v1 = vld [vmem:[%s1053_s6 + $0x68] sm:$0xff] }
 0x114   :  { %432 = vperm.xlu1 %660, %v378_v6   ;;  %427 = vperm.xlu0 %659, %v377_v7   ;;  %v401_v2 = vld [vmem:[%s1053_s6 + $0x60] sm:$0xff] }
 0x118   :  { %442 = vperm.xlu1 %660, %v380_v8   ;;  %437 = vperm.xlu0 %659, %v379_v9   ;;  %v404_v9 = vld [vmem:[%s1053_s6 + $0x78] sm:$0xff] }
 0x11c   :  { %452 = vperm.xlu1 %660, %v382_v10   ;;  %447 = vperm.xlu0 %659, %v381_v11   ;;  %v403_v10 = vld [vmem:[%s1053_s6 + $0x70] sm:$0xff] }
 0x120   :  { %462 = vperm.xlu1 %660, %v384_v12   ;;  %457 = vperm.xlu0 %659, %v383_v13  }
 0x124   :  { %472 = vperm.xlu1 %660, %v386_v14   ;;  %467 = vperm.xlu0 %659, %v385_v15  }
 0x128   :  { %482 = vperm.xlu1 %660, %v388_v16   ;;  %477 = vperm.xlu0 %659, %v387_v17  }
 0x18b   :  { %v418_v21 = vpop.permute.xlu1 %417  ;;  %v408_v22 = vpop.permute.xlu0 %407 }
 0x18c   :  { %v487_v23 = vmul.f32 %v418_v21, %v391_v18  ;;  %v485_v24 = vmul.f32 %v408_v22, %v389_v19 }
 0x18e   :  { %v510_v27 = vadd.f32 %v941_v20, %v487_v23  ;;  %v508_v28 = vadd.f32 %v941_v20, %v485_v24 }
 0x18f   :  { %v423_v29 = vpop.permute.xlu1 %422  ;;  %v413_v30 = vpop.permute.xlu0 %412 }
 0x190   :  { %526 = vst [vmem:[%s1053_s6 + $0x10] sm:$0xff] %v510_v27  ;;  %524 = vst [vmem:[%s1053_s6] sm:$0xff] %v508_v28  ;;  %v488_v31 = vmul.f32 %v423_v29, %v392_v25  ;;  %v486_v32 = vmul.f32 %v413_v30, %v390_v26 }
 0x192   :  { %v511_v35 = vadd.f32 %v941_v20, %v488_v31  ;;  %v509_v36 = vadd.f32 %v941_v20, %v486_v32 }
 0x193   :  { %v433_v37 = vpop.permute.xlu1 %432  ;;  %v428_v38 = vpop.permute.xlu0 %427 }
 0x194   :  { %527 = vst [vmem:[%s1053_s6 + $0x18] sm:$0xff] %v511_v35  ;;  %525 = vst [vmem:[%s1053_s6 + $0x8] sm:$0xff] %v509_v36  ;;  %v490_v39 = vmul.f32 %v433_v37, %v394_v33  ;;  %v489_v40 = vmul.f32 %v428_v38, %v393_v34 }
 0x196   :  { %v513_v43 = vadd.f32 %v941_v20, %v490_v39  ;;  %v512_v44 = vadd.f32 %v941_v20, %v489_v40 }
 0x197   :  { %v443_v45 = vpop.permute.xlu1 %442  ;;  %v438_v46 = vpop.permute.xlu0 %437 }
 0x198   :  { %529 = vst [vmem:[%s1053_s6 + $0x28] sm:$0xff] %v513_v43  ;;  %528 = vst [vmem:[%s1053_s6 + $0x20] sm:$0xff] %v512_v44  ;;  %v492_v47 = vmul.f32 %v443_v45, %v396_v41  ;;  %v491_v48 = vmul.f32 %v438_v46, %v395_v42 }
 0x19a   :  { %v515_v51 = vadd.f32 %v941_v20, %v492_v47  ;;  %v514_v52 = vadd.f32 %v941_v20, %v491_v48 }
 0x19b   :  { %v453_v53 = vpop.permute.xlu1 %452  ;;  %v448_v54 = vpop.permute.xlu0 %447 }
 0x19c   :  { %531 = vst [vmem:[%s1053_s6 + $0x38] sm:$0xff] %v515_v51  ;;  %530 = vst [vmem:[%s1053_s6 + $0x30] sm:$0xff] %v514_v52  ;;  %v494_v55 = vmul.f32 %v453_v53, %v398_v49  ;;  %v493_v56 = vmul.f32 %v448_v54, %v397_v50 }
 0x19e   :  { %v517_v59 = vadd.f32 %v941_v20, %v494_v55  ;;  %v516_v60 = vadd.f32 %v941_v20, %v493_v56 }
 0x19f   :  { %v463_v61 = vpop.permute.xlu1 %462  ;;  %v458_v62 = vpop.permute.xlu0 %457 }
 0x1a0   :  { %533 = vst [vmem:[%s1053_s6 + $0x48] sm:$0xff] %v517_v59  ;;  %532 = vst [vmem:[%s1053_s6 + $0x40] sm:$0xff] %v516_v60  ;;  %v496_v63 = vmul.f32 %v463_v61, %v400_v57  ;;  %v495_v0 = vmul.f32 %v458_v62, %v399_v58 }
 0x1a2   :  { %v519_v3 = vadd.f32 %v941_v20, %v496_v63  ;;  %v518_v4 = vadd.f32 %v941_v20, %v495_v0 }
 0x1a3   :  { %v473_v5 = vpop.permute.xlu1 %472  ;;  %v468_v6 = vpop.permute.xlu0 %467 }
 0x1a4   :  { %535 = vst [vmem:[%s1053_s6 + $0x58] sm:$0xff] %v519_v3  ;;  %534 = vst [vmem:[%s1053_s6 + $0x50] sm:$0xff] %v518_v4  ;;  %v498_v7 = vmul.f32 %v473_v5, %v402_v1  ;;  %v497_v8 = vmul.f32 %v468_v6, %v401_v2 }
 0x1a6   :  { %v521_v11 = vadd.f32 %v941_v20, %v498_v7  ;;  %v520_v12 = vadd.f32 %v941_v20, %v497_v8 }
 0x1a7   :  { %v483_v13 = vpop.permute.xlu1 %482  ;;  %v478_v14 = vpop.permute.xlu0 %477 }
 0x1a8   :  { %537 = vst [vmem:[%s1053_s6 + $0x68] sm:$0xff] %v521_v11  ;;  %536 = vst [vmem:[%s1053_s6 + $0x60] sm:$0xff] %v520_v12  ;;  %v500_v15 = vmul.f32 %v483_v13, %v404_v9  ;;  %v499_v16 = vmul.f32 %v478_v14, %v403_v10 }
 0x1aa   :  { %v523_v17 = vadd.f32 %v941_v20, %v500_v15  ;;  %v522_v18 = vadd.f32 %v941_v20, %v499_v16 }
 0x1ac   :  { %539 = vst [vmem:[%s1053_s6 + $0x78] sm:$0xff] %v523_v17  ;;  %538 = vst [vmem:[%s1053_s6 + $0x70] sm:$0xff] %v522_v18 }

</bundles_post_ra>
